<compile_context>
chip_gen: v7x
topology: tpu7x:2x2x1
jax: 0.10.0
libtpu: 0.0.40
codegen_flags: <defaults>
</compile_context>

<pallas_src>
import functools
import numpy as np
import jax
import jax.numpy as jnp
from jax.experimental import pallas as pl
from jax.experimental.pallas import tpu as pltpu


def _attn_kernel(*refs, num_heads, bw, n_tok, n_win_mask, mask_mode, use_bf16_exp):
    if mask_mode is None:
        (x_ref, y_ref, rb_ref,
         wq_ref, bq_ref, wk_ref, bk_ref, wv_ref, bv_ref,
         wp_ref, bp_ref, o_ref) = refs
        mask_ref = None
    else:
        (x_ref, y_ref, rb_ref, mask_ref,
         wq_ref, bq_ref, wk_ref, bk_ref, wv_ref, bv_ref,
         wp_ref, bp_ref, o_ref) = refs

    C = x_ref.shape[-1]
    hd = C // num_heads
    rows = bw * n_tok

    # Cast to bf16 in-kernel (VPU is free under MXU-bound compute); reshape
    # only merges leading dims so it is layout-free.
    x2 = x_ref[...].reshape(rows, C).astype(jnp.bfloat16)
    y2 = y_ref[...].reshape(rows, C).astype(jnp.bfloat16)

    # q / k / v projections: full K=C matmuls on the MXU, bf16 in, f32 acc.
    # qk scale is already folded into wq/bq by the wrapper; wk/wv were split
    # on the host so no (rows, 2C) lane slice is needed here.
    q = jnp.dot(x2, wq_ref[...], preferred_element_type=jnp.float32) + bq_ref[...]
    k = jnp.dot(y2, wk_ref[...], preferred_element_type=jnp.float32) + bk_ref[...]
    v = jnp.dot(y2, wv_ref[...], preferred_element_type=jnp.float32) + bv_ref[...]

    q16 = q.astype(jnp.bfloat16).reshape(bw, n_tok, C)
    k16 = k.astype(jnp.bfloat16).reshape(bw, n_tok, C)
    v16 = v.astype(jnp.bfloat16).reshape(bw, n_tok, C)

    rb = rb_ref[...]                                   # (H, N, N) f32, resident
    if mask_mode is not None:
        mask = mask_ref[...]                           # (BW,N,N) or (nW,N,N) f32

    acc = jnp.zeros((rows, C), jnp.float32)
    # TODO(synk): batched-head dot_general would remove the per-head lane
    # slices; kept as a short static loop for reliable Mosaic lowering.
    for h in range(num_heads):
        qh = q16[:, :, h * hd:(h + 1) * hd]            # (BW, N, hd)
        kh = k16[:, :, h * hd:(h + 1) * hd]
        vh = v16[:, :, h * hd:(h + 1) * hd]

        s = jnp.einsum('bnd,bmd->bnm', qh, kh,
                       preferred_element_type=jnp.float32)       # (BW, N, N) f32
        s = s + rb[h]                                  # (N, N) broadcast over BW
        if mask_mode == "block":
            s = s + mask                               # (BW, N, N)
        elif mask_mode == "full":
            # groups start at multiples of nW, so windows cycle 0..nW-1:
            s = (s.reshape(bw // n_win_mask, n_win_mask, n_tok, n_tok)
                 + mask[None]).reshape(bw, n_tok, n_tok)

        # hand-rolled softmax; normalisation deferred until after PV matmul.
        m = jnp.max(s, axis=-1, keepdims=True)
        z = s - m
        if use_bf16_exp:                               # EUP bf16 path (v6e/v7x)
            p = jnp.exp(z.astype(jnp.bfloat16))
            l = jnp.sum(p.astype(jnp.float32), axis=-1, keepdims=True)
            p16 = p
        else:                                          # v5e EUP: f32 only
            p = jnp.exp(z)
            l = jnp.sum(p, axis=-1, keepdims=True)
            p16 = p.astype(jnp.bfloat16)

        oh = jnp.einsum('bnm,bmd->bnd', p16, vh,
                        preferred_element_type=jnp.float32)      # (BW, N, hd)
        oh = oh * pl.reciprocal(l, approx=True)        # 1/l on the EUP slot

        # Head concat folded into the output projection (per-head wp slab),
        # accumulated in f32.
        acc = acc + jnp.dot(oh.reshape(rows, hd).astype(jnp.bfloat16),
                            wp_ref[h * hd:(h + 1) * hd, :],
                            preferred_element_type=jnp.float32)

    out = acc + bp_ref[...]
    o_ref[...] = out.reshape(bw, n_tok, C).astype(o_ref.dtype)


def make_relative_position_bias(table, window_size, num_heads):
    """Pure-JAX glue: gather the (H, N, N) relative position bias."""
    Wh, Ww = window_size
    coords_h = jnp.arange(Wh)
    coords_w = jnp.arange(Ww)
    coords = jnp.stack(jnp.meshgrid(coords_h, coords_w, indexing="ij"))   # (2, Wh, Ww)
    coords_flatten = coords.reshape(2, -1)                                # (2, N)
    rel = coords_flatten[:, :, None] - coords_flatten[:, None, :]         # (2, N, N)
    rel = jnp.transpose(rel, (1, 2, 0))                                   # (N, N, 2)
    rel = rel.at[:, :, 0].add(Wh - 1)
    rel = rel.at[:, :, 1].add(Ww - 1)
    rel = rel.at[:, :, 0].multiply(2 * Ww - 1)
    index = rel.sum(-1)                                                   # (N, N)
    N = Wh * Ww
    bias = table[index.reshape(-1)].reshape(N, N, num_heads)              # (N, N, H)
    return jnp.transpose(bias, (2, 0, 1)).astype(jnp.float32)             # (H, N, N)


def _choose_bw(B_, N, nW, *, target_rows=256, max_rows=1024, min_grid=4):
    """Largest window-batch that divides B_, is mask-compatible, keeps
    rows <= max_rows, leaves >= min_grid grid steps (pipeline / megacore),
    and gives >= target_rows MXU rows when possible."""
    cands = []
    for c in range(1, B_ + 1):
        if B_ % c:
            continue
        if nW is not None and (nW % c != 0) and (c % nW != 0):
            continue
        if c > 1 and c * N > max_rows:
            continue
        cands.append(c)
    if not cands:
        return 1
    good = [c for c in cands if B_ // c >= min_grid] or cands
    for c in good:
        if c * N >= target_rows:
            return c
    return good[-1]


def cross_window_attention(x, y, params, window_size, num_heads,
                           mask=None, qk_scale=None):
    B_, N, C = x.shape
    assert N == window_size[0] * window_size[1]
    assert C % num_heads == 0
    hd = C // num_heads
    scale = qk_scale if qk_scale is not None else hd ** (-0.5)

    rel_bias = make_relative_position_bias(
        params["rel_table"], window_size, num_heads)                      # (H, N, N)

    # Generation-aware sizing (v7x: 64 MiB VMEM, bf16 EUP; v5e: f32 EUP).
    try:
        kind = jax.devices()[0].device_kind.lower()
    except Exception:
        kind = ""
    is_v7 = ("v7" in kind) or ("7x" in kind)
    is_v6 = "v6" in kind
    use_bf16_exp = bool(is_v6 or is_v7)
    max_rows = 512 if is_v7 else 1024
    if is_v7:
        vmem_limit = 48 << 20
    elif is_v6 or ("v5" in kind):
        vmem_limit = 64 << 20
    else:
        vmem_limit = None

    nW = None if mask is None else int(mask.shape[0])
    if nW is not None:
        assert B_ % nW == 0
    # NOTE: assumes B_ is laid out as (batch, nW) with the window index
    # varying fastest, exactly as Swin's window_partition produces.
    BW = _choose_bw(B_, N, nW, target_rows=256, max_rows=max_rows, min_grid=4)
    G = B_ // BW

    if mask is None:
        mask_mode, n_win_mask = None, 1
        mask_inputs, mask_specs = [], []
    elif nW % BW == 0:
        mask_mode, n_win_mask = "block", BW
        nblocks = nW // BW
        mask_inputs = [mask.astype(jnp.float32)]
        mask_specs = [pl.BlockSpec((BW, N, N), lambda g: (g % nblocks, 0, 0))]
    else:  # BW % nW == 0: mask stays fully resident, applied via reshape
        mask_mode, n_win_mask = "full", nW
        mask_inputs = [mask.astype(jnp.float32)]
        mask_specs = [pl.BlockSpec((nW, N, N), lambda g: (0, 0, 0))]

    # Fold the qk scale into the q projection; split wkv into wk / wv; cast
    # MXU weight operands to bf16 (resident, fetched once).
    wq_b = (params["wq"] * scale).astype(jnp.bfloat16)
    bq_b = (params["bq"] * scale).astype(jnp.float32).reshape(1, C)
    wk_b = params["wkv"][:, :C].astype(jnp.bfloat16)
    wv_b = params["wkv"][:, C:].astype(jnp.bfloat16)
    bk_b = params["bkv"][:C].astype(jnp.float32).reshape(1, C)
    bv_b = params["bkv"][C:].astype(jnp.float32).reshape(1, C)
    wp_b = params["wproj"].astype(jnp.bfloat16)
    bp_b = params["bproj"].astype(jnp.float32).reshape(1, C)

    kernel = functools.partial(
        _attn_kernel, num_heads=num_heads, bw=BW, n_tok=N,
        n_win_mask=n_win_mask, mask_mode=mask_mode, use_bf16_exp=use_bf16_exp)

    full = lambda shape: pl.BlockSpec(shape, lambda g, _s=shape: (0,) * len(_s))

    in_specs = ([pl.BlockSpec((BW, N, C), lambda g: (g, 0, 0)),            # x
                 pl.BlockSpec((BW, N, C), lambda g: (g, 0, 0)),            # y
                 full((num_heads, N, N))]                                  # rel_bias
                + mask_specs
                + [full((C, C)), full((1, C)),                             # wq, bq
                   full((C, C)), full((1, C)),                             # wk, bk
                   full((C, C)), full((1, C)),                             # wv, bv
                   full((C, C)), full((1, C))])                            # wp, bp

    cp_kwargs = dict(dimension_semantics=("parallel",))
    if vmem_limit is not None:
        cp_kwargs["vmem_limit_bytes"] = vmem_limit

    out = pl.pallas_call(
        kernel,
        out_shape=jax.ShapeDtypeStruct((B_, N, C), x.dtype),
        grid=(G,),
        in_specs=in_specs,
        out_specs=pl.BlockSpec((BW, N, C), lambda g: (g, 0, 0)),
        compiler_params=pltpu.CompilerParams(**cp_kwargs),
    )(x, y, rel_bias, *mask_inputs,
      wq_b, bq_b, wk_b, bk_b, wv_b, bv_b, wp_b, bp_b)
    return out


def reference(x, y, params, window_size, num_heads, mask=None, qk_scale=None):
    """Pure-JAX f32 reference mirroring the PyTorch forward."""
    B_, N, C = x.shape
    hd = C // num_heads
    scale = qk_scale if qk_scale is not None else hd ** (-0.5)
    q = x @ params["wq"] + params["bq"]
    kv = y @ params["wkv"] + params["bkv"]
    k, v = kv[..., :C], kv[..., C:]
    q = (q * scale).reshape(B_, N, num_heads, hd).transpose(0, 2, 1, 3)
    k = k.reshape(B_, N, num_heads, hd).transpose(0, 2, 1, 3)
    v = v.reshape(B_, N, num_heads, hd).transpose(0, 2, 1, 3)
    attn = jnp.einsum("bhnd,bhmd->bhnm", q, k)
    rel_bias = make_relative_position_bias(params["rel_table"], window_size, num_heads)
    attn = attn + rel_bias[None]
    if mask is not None:
        nW = mask.shape[0]
        attn = attn.reshape(B_ // nW, nW, num_heads, N, N) + mask[None, :, None]
        attn = attn.reshape(B_, num_heads, N, N)
    attn = jax.nn.softmax(attn, axis=-1)
    out = jnp.einsum("bhnm,bhmd->bhnd", attn, v)
    out = out.transpose(0, 2, 1, 3).reshape(B_, N, C)
    return out @ params["wproj"] + params["bproj"]


if __name__ == "__main__":
    # Small shapes: dim=32, heads=4, window 4x4 -> N=16.
    dim, num_heads = 32, 4
    window_size = (4, 4)
    N = window_size[0] * window_size[1]

    key = jax.random.PRNGKey(0)
    ks = jax.random.split(key, 14)

    params = {
        "rel_table": 0.02 * jax.random.normal(
            ks[0], ((2 * window_size[0] - 1) * (2 * window_size[1] - 1), num_heads),
            dtype=jnp.float32),
        "wq": 0.05 * jax.random.normal(ks[1], (dim, dim), dtype=jnp.float32),
        "bq": 0.01 * jax.random.normal(ks[2], (dim,), dtype=jnp.float32),
        "wkv": 0.05 * jax.random.normal(ks[3], (dim, 2 * dim), dtype=jnp.float32),
        "bkv": 0.01 * jax.random.normal(ks[4], (2 * dim,), dtype=jnp.float32),
        "wproj": 0.05 * jax.random.normal(ks[5], (dim, dim), dtype=jnp.float32),
        "bproj": 0.01 * jax.random.normal(ks[6], (dim,), dtype=jnp.float32),
    }

    # Path 1: no shift mask (batch=2, nW=4 -> B_=8).
    B_1 = 2 * 4
    x1 = jax.random.normal(ks[7], (B_1, N, dim), dtype=jnp.float32)
    y1 = jax.random.normal(ks[8], (B_1, N, dim), dtype=jnp.float32)
    out = cross_window_attention(x1, y1, params, window_size, num_heads, mask=None)
    out = jax.block_until_ready(out)
    ref = reference(x1, y1, params, window_size, num_heads, mask=None)
    np.testing.assert_allclose(np.asarray(out), np.asarray(ref), rtol=2e-2, atol=2e-3)

    # Path 2: shifted-window mask, nW=4 (nW % BW == 0 -> "block" mask path).
    mpat = jax.random.bernoulli(ks[9], 0.3, (4, N, N))
    mask4 = jnp.where(mpat, -100.0, 0.0).astype(jnp.float32)
    out_m = cross_window_attention(x1, y1, params, window_size, num_heads, mask=mask4)
    out_m = jax.block_until_ready(out_m)
    ref_m = reference(x1, y1, params, window_size, num_heads, mask=mask4)
    np.testing.assert_allclose(np.asarray(out_m), np.asarray(ref_m), rtol=2e-2, atol=2e-3)

    # Path 3: nW=2, batch=8 -> B_=16 (BW % nW == 0 -> resident "full" mask path).
    B_3 = 8 * 2
    x3 = jax.random.normal(ks[10], (B_3, N, dim), dtype=jnp.float32)
    y3 = jax.random.normal(ks[11], (B_3, N, dim), dtype=jnp.float32)
    mpat2 = jax.random.bernoulli(ks[12], 0.3, (2, N, N))
    mask2 = jnp.where(mpat2, -100.0, 0.0).astype(jnp.float32)
    out_f = cross_window_attention(x3, y3, params, window_size, num_heads, mask=mask2)
    out_f = jax.block_until_ready(out_f)
    ref_f = reference(x3, y3, params, window_size, num_heads, mask=mask2)
    np.testing.assert_allclose(np.asarray(out_f), np.asarray(ref_f), rtol=2e-2, atol=2e-3)

    print("KERNEL_OK")
</pallas_src>

<mosaic_0001>
module attributes {stable_mosaic.version = 11 : i64} {
  func.func @_attn_kernel(%arg0: i32, %arg1: memref<2x16x32xf32, #tpu.memory_space<vmem>>, %arg2: memref<2x16x32xf32, #tpu.memory_space<vmem>>, %arg3: memref<4x16x16xf32, #tpu.memory_space<vmem>>, %arg4: memref<32x32xbf16, #tpu.memory_space<vmem>>, %arg5: memref<1x32xf32, #tpu.memory_space<vmem>>, %arg6: memref<32x32xbf16, #tpu.memory_space<vmem>>, %arg7: memref<1x32xf32, #tpu.memory_space<vmem>>, %arg8: memref<32x32xbf16, #tpu.memory_space<vmem>>, %arg9: memref<1x32xf32, #tpu.memory_space<vmem>>, %arg10: memref<32x32xbf16, #tpu.memory_space<vmem>>, %arg11: memref<1x32xf32, #tpu.memory_space<vmem>>, %arg12: memref<2x16x32xf32, #tpu.memory_space<vmem>>) attributes {dimension_semantics = [#tpu.dimension_semantics<parallel>], iteration_bounds = array<i64: 4>, scalar_prefetch = 0 : i64, scratch_operands = 0 : i64, tpu.core_type = #tpu.core_type<tc>, window_params = [{transform_indices = @transform_0, window_bounds = array<i64: 2, 16, 32>}, {transform_indices = @transform_1, window_bounds = array<i64: 2, 16, 32>}, {pipeline_mode = #tpu.pipeline_mode<synchronous>, transform_indices = @transform_2, window_bounds = array<i64: 4, 16, 16>}, {pipeline_mode = #tpu.pipeline_mode<synchronous>, transform_indices = @transform_3, window_bounds = array<i64: 32, 32>}, {pipeline_mode = #tpu.pipeline_mode<synchronous>, transform_indices = @transform_4, window_bounds = array<i64: 1, 32>}, {pipeline_mode = #tpu.pipeline_mode<synchronous>, transform_indices = @transform_5, window_bounds = array<i64: 32, 32>}, {pipeline_mode = #tpu.pipeline_mode<synchronous>, transform_indices = @transform_6, window_bounds = array<i64: 1, 32>}, {pipeline_mode = #tpu.pipeline_mode<synchronous>, transform_indices = @transform_7, window_bounds = array<i64: 32, 32>}, {pipeline_mode = #tpu.pipeline_mode<synchronous>, transform_indices = @transform_8, window_bounds = array<i64: 1, 32>}, {pipeline_mode = #tpu.pipeline_mode<synchronous>, transform_indices = @transform_9, window_bounds = array<i64: 32, 32>}, {pipeline_mode = #tpu.pipeline_mode<synchronous>, transform_indices = @transform_10, window_bounds = array<i64: 1, 32>}, {transform_indices = @transform_11, window_bounds = array<i64: 2, 16, 32>}]} {
    %c0 = arith.constant 0 : index
    %c0_0 = arith.constant 0 : index
    %c0_1 = arith.constant 0 : index
    %0 = vector.load %arg1[%c0, %c0_0, %c0_1] : memref<2x16x32xf32, #tpu.memory_space<vmem>>, vector<2x16x32xf32>
    %1 = vector.shape_cast %0 : vector<2x16x32xf32> to vector<32x32xf32>
    %2 = arith.truncf %1 : vector<32x32xf32> to vector<32x32xbf16>
    %c0_2 = arith.constant 0 : index
    %c0_3 = arith.constant 0 : index
    %c0_4 = arith.constant 0 : index
    %3 = vector.load %arg2[%c0_2, %c0_3, %c0_4] : memref<2x16x32xf32, #tpu.memory_space<vmem>>, vector<2x16x32xf32>
    %4 = vector.shape_cast %3 : vector<2x16x32xf32> to vector<32x32xf32>
    %5 = arith.truncf %4 : vector<32x32xf32> to vector<32x32xbf16>
    %c0_5 = arith.constant 0 : index
    %c0_6 = arith.constant 0 : index
    %6 = vector.load %arg4[%c0_5, %c0_6] : memref<32x32xbf16, #tpu.memory_space<vmem>>, vector<32x32xbf16>
    %cst = arith.constant dense<0.000000e+00> : vector<32x32xf32>
    %7 = tpu.matmul %2, %6, %cst {dimension_numbers = #tpu.dot_dimension_numbers<[1], [0], [0], [1], [0, 0, 1, 1], [], []>} : vector<32x32xbf16>, vector<32x32xbf16>, vector<32x32xf32> -> vector<32x32xf32>
    %c0_7 = arith.constant 0 : index
    %c0_8 = arith.constant 0 : index
    %8 = vector.load %arg5[%c0_7, %c0_8] : memref<1x32xf32, #tpu.memory_space<vmem>>, vector<1x32xf32>
    %9 = vector.broadcast %8 : vector<1x32xf32> to vector<32x32xf32>
    %10 = arith.addf %7, %9 : vector<32x32xf32>
    %c0_9 = arith.constant 0 : index
    %c0_10 = arith.constant 0 : index
    %11 = vector.load %arg6[%c0_9, %c0_10] : memref<32x32xbf16, #tpu.memory_space<vmem>>, vector<32x32xbf16>
    %cst_11 = arith.constant dense<0.000000e+00> : vector<32x32xf32>
    %12 = tpu.matmul %5, %11, %cst_11 {dimension_numbers = #tpu.dot_dimension_numbers<[1], [0], [0], [1], [0, 0, 1, 1], [], []>} : vector<32x32xbf16>, vector<32x32xbf16>, vector<32x32xf32> -> vector<32x32xf32>
    %c0_12 = arith.constant 0 : index
    %c0_13 = arith.constant 0 : index
    %13 = vector.load %arg7[%c0_12, %c0_13] : memref<1x32xf32, #tpu.memory_space<vmem>>, vector<1x32xf32>
    %14 = vector.broadcast %13 : vector<1x32xf32> to vector<32x32xf32>
    %15 = arith.addf %12, %14 : vector<32x32xf32>
    %c0_14 = arith.constant 0 : index
    %c0_15 = arith.constant 0 : index
    %16 = vector.load %arg8[%c0_14, %c0_15] : memref<32x32xbf16, #tpu.memory_space<vmem>>, vector<32x32xbf16>
    %cst_16 = arith.constant dense<0.000000e+00> : vector<32x32xf32>
    %17 = tpu.matmul %5, %16, %cst_16 {dimension_numbers = #tpu.dot_dimension_numbers<[1], [0], [0], [1], [0, 0, 1, 1], [], []>} : vector<32x32xbf16>, vector<32x32xbf16>, vector<32x32xf32> -> vector<32x32xf32>
    %c0_17 = arith.constant 0 : index
    %c0_18 = arith.constant 0 : index
    %18 = vector.load %arg9[%c0_17, %c0_18] : memref<1x32xf32, #tpu.memory_space<vmem>>, vector<1x32xf32>
    %19 = vector.broadcast %18 : vector<1x32xf32> to vector<32x32xf32>
    %20 = arith.addf %17, %19 : vector<32x32xf32>
    %21 = arith.truncf %10 : vector<32x32xf32> to vector<32x32xbf16>
    %22 = vector.shape_cast %21 : vector<32x32xbf16> to vector<2x16x32xbf16>
    %23 = arith.truncf %15 : vector<32x32xf32> to vector<32x32xbf16>
    %24 = vector.shape_cast %23 : vector<32x32xbf16> to vector<2x16x32xbf16>
    %25 = arith.truncf %20 : vector<32x32xf32> to vector<32x32xbf16>
    %26 = vector.shape_cast %25 : vector<32x32xbf16> to vector<2x16x32xbf16>
    %c0_19 = arith.constant 0 : index
    %c0_20 = arith.constant 0 : index
    %c0_21 = arith.constant 0 : index
    %27 = vector.load %arg3[%c0_19, %c0_20, %c0_21] : memref<4x16x16xf32, #tpu.memory_space<vmem>>, vector<4x16x16xf32>
    %cst_22 = arith.constant 0.000000e+00 : f32
    %28 = vector.broadcast %cst_22 : f32 to vector<32x32xf32>
    %29 = vector.extract_strided_slice %22 {offsets = [0, 0, 0], sizes = [2, 16, 8], strides = [1, 1, 1]} : vector<2x16x32xbf16> to vector<2x16x8xbf16>
    %30 = vector.extract_strided_slice %24 {offsets = [0, 0, 0], sizes = [2, 16, 8], strides = [1, 1, 1]} : vector<2x16x32xbf16> to vector<2x16x8xbf16>
    %31 = vector.extract_strided_slice %26 {offsets = [0, 0, 0], sizes = [2, 16, 8], strides = [1, 1, 1]} : vector<2x16x32xbf16> to vector<2x16x8xbf16>
    "tpu.trace_start"() <{level = 10 : i32, message = "bnd,bmd->bnm"}> : () -> ()
    %cst_23 = arith.constant dense<0.000000e+00> : vector<2x16x16xf32>
    %32 = tpu.matmul %29, %30, %cst_23 {dimension_numbers = #tpu.dot_dimension_numbers<[2], [2], [1], [1], [0, 0, 0, 1, 1, 1], [0], [0]>} : vector<2x16x8xbf16>, vector<2x16x8xbf16>, vector<2x16x16xf32> -> vector<2x16x16xf32>
    "tpu.trace_stop"() : () -> ()
    %33 = vector.extract_strided_slice %27 {offsets = [0, 0, 0], sizes = [1, 16, 16], strides = [1, 1, 1]} : vector<4x16x16xf32> to vector<1x16x16xf32>
    %34 = vector.shape_cast %33 : vector<1x16x16xf32> to vector<16x16xf32>
    %35 = vector.shape_cast %34 : vector<16x16xf32> to vector<1x16x16xf32>
    %36 = vector.broadcast %35 : vector<1x16x16xf32> to vector<2x16x16xf32>
    %37 = arith.addf %32, %36 : vector<2x16x16xf32>
    %cst_24 = arith.constant dense<0xFF800000> : vector<2x16xf32>
    %38 = vector.multi_reduction <maximumf>, %37, %cst_24 [2] : vector<2x16x16xf32> to vector<2x16xf32>
    %39 = vector.shape_cast %38 : vector<2x16xf32> to vector<2x16x1xf32>
    %40 = vector.broadcast %39 : vector<2x16x1xf32> to vector<2x16x16xf32>
    %41 = arith.subf %37, %40 : vector<2x16x16xf32>
    %42 = math.exp %41 : vector<2x16x16xf32>
    %cst_25 = arith.constant dense<0.000000e+00> : vector<2x16xf32>
    %43 = vector.multi_reduction <add>, %42, %cst_25 [2] : vector<2x16x16xf32> to vector<2x16xf32>
    %44 = vector.shape_cast %43 : vector<2x16xf32> to vector<2x16x1xf32>
    %45 = arith.truncf %42 : vector<2x16x16xf32> to vector<2x16x16xbf16>
    "tpu.trace_start"() <{level = 10 : i32, message = "bnm,bmd->bnd"}> : () -> ()
    %cst_26 = arith.constant dense<0.000000e+00> : vector<2x16x8xf32>
    %46 = tpu.matmul %45, %31, %cst_26 {dimension_numbers = #tpu.dot_dimension_numbers<[2], [1], [1], [2], [0, 0, 0, 1, 1, 2], [0], [0]>} : vector<2x16x16xbf16>, vector<2x16x8xbf16>, vector<2x16x8xf32> -> vector<2x16x8xf32>
    "tpu.trace_stop"() : () -> ()
    %47 = tpu.reciprocal %44 {approx = true} : vector<2x16x1xf32> -> vector<2x16x1xf32>
    %48 = vector.broadcast %47 : vector<2x16x1xf32> to vector<2x16x8xf32>
    %49 = arith.mulf %46, %48 : vector<2x16x8xf32>
    %50 = vector.shape_cast %49 : vector<2x16x8xf32> to vector<32x8xf32>
    %51 = arith.truncf %50 : vector<32x8xf32> to vector<32x8xbf16>
    %c0_27 = arith.constant 0 : index
    %c0_28 = arith.constant 0 : index
    %52 = vector.load %arg10[%c0_27, %c0_28] : memref<32x32xbf16, #tpu.memory_space<vmem>>, vector<8x32xbf16>
    %cst_29 = arith.constant dense<0.000000e+00> : vector<32x32xf32>
    %53 = tpu.matmul %51, %52, %cst_29 {dimension_numbers = #tpu.dot_dimension_numbers<[1], [0], [0], [1], [0, 0, 1, 1], [], []>} : vector<32x8xbf16>, vector<8x32xbf16>, vector<32x32xf32> -> vector<32x32xf32>
    %54 = arith.addf %28, %53 : vector<32x32xf32>
    %55 = vector.extract_strided_slice %22 {offsets = [0, 0, 8], sizes = [2, 16, 8], strides = [1, 1, 1]} : vector<2x16x32xbf16> to vector<2x16x8xbf16>
    %56 = vector.extract_strided_slice %24 {offsets = [0, 0, 8], sizes = [2, 16, 8], strides = [1, 1, 1]} : vector<2x16x32xbf16> to vector<2x16x8xbf16>
    %57 = vector.extract_strided_slice %26 {offsets = [0, 0, 8], sizes = [2, 16, 8], strides = [1, 1, 1]} : vector<2x16x32xbf16> to vector<2x16x8xbf16>
    "tpu.trace_start"() <{level = 10 : i32, message = "bnd,bmd->bnm"}> : () -> ()
    %cst_30 = arith.constant dense<0.000000e+00> : vector<2x16x16xf32>
    %58 = tpu.matmul %55, %56, %cst_30 {dimension_numbers = #tpu.dot_dimension_numbers<[2], [2], [1], [1], [0, 0, 0, 1, 1, 1], [0], [0]>} : vector<2x16x8xbf16>, vector<2x16x8xbf16>, vector<2x16x16xf32> -> vector<2x16x16xf32>
    "tpu.trace_stop"() : () -> ()
    %59 = vector.extract_strided_slice %27 {offsets = [1, 0, 0], sizes = [1, 16, 16], strides = [1, 1, 1]} : vector<4x16x16xf32> to vector<1x16x16xf32>
    %60 = vector.shape_cast %59 : vector<1x16x16xf32> to vector<16x16xf32>
    %61 = vector.shape_cast %60 : vector<16x16xf32> to vector<1x16x16xf32>
    %62 = vector.broadcast %61 : vector<1x16x16xf32> to vector<2x16x16xf32>
    %63 = arith.addf %58, %62 : vector<2x16x16xf32>
    %cst_31 = arith.constant dense<0xFF800000> : vector<2x16xf32>
    %64 = vector.multi_reduction <maximumf>, %63, %cst_31 [2] : vector<2x16x16xf32> to vector<2x16xf32>
    %65 = vector.shape_cast %64 : vector<2x16xf32> to vector<2x16x1xf32>
    %66 = vector.broadcast %65 : vector<2x16x1xf32> to vector<2x16x16xf32>
    %67 = arith.subf %63, %66 : vector<2x16x16xf32>
    %68 = math.exp %67 : vector<2x16x16xf32>
    %cst_32 = arith.constant dense<0.000000e+00> : vector<2x16xf32>
    %69 = vector.multi_reduction <add>, %68, %cst_32 [2] : vector<2x16x16xf32> to vector<2x16xf32>
    %70 = vector.shape_cast %69 : vector<2x16xf32> to vector<2x16x1xf32>
    %71 = arith.truncf %68 : vector<2x16x16xf32> to vector<2x16x16xbf16>
    "tpu.trace_start"() <{level = 10 : i32, message = "bnm,bmd->bnd"}> : () -> ()
    %cst_33 = arith.constant dense<0.000000e+00> : vector<2x16x8xf32>
    %72 = tpu.matmul %71, %57, %cst_33 {dimension_numbers = #tpu.dot_dimension_numbers<[2], [1], [1], [2], [0, 0, 0, 1, 1, 2], [0], [0]>} : vector<2x16x16xbf16>, vector<2x16x8xbf16>, vector<2x16x8xf32> -> vector<2x16x8xf32>
    "tpu.trace_stop"() : () -> ()
    %73 = tpu.reciprocal %70 {approx = true} : vector<2x16x1xf32> -> vector<2x16x1xf32>
    %74 = vector.broadcast %73 : vector<2x16x1xf32> to vector<2x16x8xf32>
    %75 = arith.mulf %72, %74 : vector<2x16x8xf32>
    %76 = vector.shape_cast %75 : vector<2x16x8xf32> to vector<32x8xf32>
    %77 = arith.truncf %76 : vector<32x8xf32> to vector<32x8xbf16>
    %c8 = arith.constant 8 : index
    %c0_34 = arith.constant 0 : index
    %78 = vector.load %arg10[%c8, %c0_34] : memref<32x32xbf16, #tpu.memory_space<vmem>>, vector<8x32xbf16>
    %cst_35 = arith.constant dense<0.000000e+00> : vector<32x32xf32>
    %79 = tpu.matmul %77, %78, %cst_35 {dimension_numbers = #tpu.dot_dimension_numbers<[1], [0], [0], [1], [0, 0, 1, 1], [], []>} : vector<32x8xbf16>, vector<8x32xbf16>, vector<32x32xf32> -> vector<32x32xf32>
    %80 = arith.addf %54, %79 : vector<32x32xf32>
    %81 = vector.extract_strided_slice %22 {offsets = [0, 0, 16], sizes = [2, 16, 8], strides = [1, 1, 1]} : vector<2x16x32xbf16> to vector<2x16x8xbf16>
    %82 = vector.extract_strided_slice %24 {offsets = [0, 0, 16], sizes = [2, 16, 8], strides = [1, 1, 1]} : vector<2x16x32xbf16> to vector<2x16x8xbf16>
    %83 = vector.extract_strided_slice %26 {offsets = [0, 0, 16], sizes = [2, 16, 8], strides = [1, 1, 1]} : vector<2x16x32xbf16> to vector<2x16x8xbf16>
    "tpu.trace_start"() <{level = 10 : i32, message = "bnd,bmd->bnm"}> : () -> ()
    %cst_36 = arith.constant dense<0.000000e+00> : vector<2x16x16xf32>
    %84 = tpu.matmul %81, %82, %cst_36 {dimension_numbers = #tpu.dot_dimension_numbers<[2], [2], [1], [1], [0, 0, 0, 1, 1, 1], [0], [0]>} : vector<2x16x8xbf16>, vector<2x16x8xbf16>, vector<2x16x16xf32> -> vector<2x16x16xf32>
    "tpu.trace_stop"() : () -> ()
    %85 = vector.extract_strided_slice %27 {offsets = [2, 0, 0], sizes = [1, 16, 16], strides = [1, 1, 1]} : vector<4x16x16xf32> to vector<1x16x16xf32>
    %86 = vector.shape_cast %85 : vector<1x16x16xf32> to vector<16x16xf32>
    %87 = vector.shape_cast %86 : vector<16x16xf32> to vector<1x16x16xf32>
    %88 = vector.broadcast %87 : vector<1x16x16xf32> to vector<2x16x16xf32>
    %89 = arith.addf %84, %88 : vector<2x16x16xf32>
    %cst_37 = arith.constant dense<0xFF800000> : vector<2x16xf32>
    %90 = vector.multi_reduction <maximumf>, %89, %cst_37 [2] : vector<2x16x16xf32> to vector<2x16xf32>
    %91 = vector.shape_cast %90 : vector<2x16xf32> to vector<2x16x1xf32>
    %92 = vector.broadcast %91 : vector<2x16x1xf32> to vector<2x16x16xf32>
    %93 = arith.subf %89, %92 : vector<2x16x16xf32>
    %94 = math.exp %93 : vector<2x16x16xf32>
    %cst_38 = arith.constant dense<0.000000e+00> : vector<2x16xf32>
    %95 = vector.multi_reduction <add>, %94, %cst_38 [2] : vector<2x16x16xf32> to vector<2x16xf32>
    %96 = vector.shape_cast %95 : vector<2x16xf32> to vector<2x16x1xf32>
    %97 = arith.truncf %94 : vector<2x16x16xf32> to vector<2x16x16xbf16>
    "tpu.trace_start"() <{level = 10 : i32, message = "bnm,bmd->bnd"}> : () -> ()
    %cst_39 = arith.constant dense<0.000000e+00> : vector<2x16x8xf32>
    %98 = tpu.matmul %97, %83, %cst_39 {dimension_numbers = #tpu.dot_dimension_numbers<[2], [1], [1], [2], [0, 0, 0, 1, 1, 2], [0], [0]>} : vector<2x16x16xbf16>, vector<2x16x8xbf16>, vector<2x16x8xf32> -> vector<2x16x8xf32>
    "tpu.trace_stop"() : () -> ()
    %99 = tpu.reciprocal %96 {approx = true} : vector<2x16x1xf32> -> vector<2x16x1xf32>
    %100 = vector.broadcast %99 : vector<2x16x1xf32> to vector<2x16x8xf32>
    %101 = arith.mulf %98, %100 : vector<2x16x8xf32>
    %102 = vector.shape_cast %101 : vector<2x16x8xf32> to vector<32x8xf32>
    %103 = arith.truncf %102 : vector<32x8xf32> to vector<32x8xbf16>
    %c16 = arith.constant 16 : index
    %c0_40 = arith.constant 0 : index
    %104 = vector.load %arg10[%c16, %c0_40] : memref<32x32xbf16, #tpu.memory_space<vmem>>, vector<8x32xbf16>
    %cst_41 = arith.constant dense<0.000000e+00> : vector<32x32xf32>
    %105 = tpu.matmul %103, %104, %cst_41 {dimension_numbers = #tpu.dot_dimension_numbers<[1], [0], [0], [1], [0, 0, 1, 1], [], []>} : vector<32x8xbf16>, vector<8x32xbf16>, vector<32x32xf32> -> vector<32x32xf32>
    %106 = arith.addf %80, %105 : vector<32x32xf32>
    %107 = vector.extract_strided_slice %22 {offsets = [0, 0, 24], sizes = [2, 16, 8], strides = [1, 1, 1]} : vector<2x16x32xbf16> to vector<2x16x8xbf16>
    %108 = vector.extract_strided_slice %24 {offsets = [0, 0, 24], sizes = [2, 16, 8], strides = [1, 1, 1]} : vector<2x16x32xbf16> to vector<2x16x8xbf16>
    %109 = vector.extract_strided_slice %26 {offsets = [0, 0, 24], sizes = [2, 16, 8], strides = [1, 1, 1]} : vector<2x16x32xbf16> to vector<2x16x8xbf16>
    "tpu.trace_start"() <{level = 10 : i32, message = "bnd,bmd->bnm"}> : () -> ()
    %cst_42 = arith.constant dense<0.000000e+00> : vector<2x16x16xf32>
    %110 = tpu.matmul %107, %108, %cst_42 {dimension_numbers = #tpu.dot_dimension_numbers<[2], [2], [1], [1], [0, 0, 0, 1, 1, 1], [0], [0]>} : vector<2x16x8xbf16>, vector<2x16x8xbf16>, vector<2x16x16xf32> -> vector<2x16x16xf32>
    "tpu.trace_stop"() : () -> ()
    %111 = vector.extract_strided_slice %27 {offsets = [3, 0, 0], sizes = [1, 16, 16], strides = [1, 1, 1]} : vector<4x16x16xf32> to vector<1x16x16xf32>
    %112 = vector.shape_cast %111 : vector<1x16x16xf32> to vector<16x16xf32>
    %113 = vector.shape_cast %112 : vector<16x16xf32> to vector<1x16x16xf32>
    %114 = vector.broadcast %113 : vector<1x16x16xf32> to vector<2x16x16xf32>
    %115 = arith.addf %110, %114 : vector<2x16x16xf32>
    %cst_43 = arith.constant dense<0xFF800000> : vector<2x16xf32>
    %116 = vector.multi_reduction <maximumf>, %115, %cst_43 [2] : vector<2x16x16xf32> to vector<2x16xf32>
    %117 = vector.shape_cast %116 : vector<2x16xf32> to vector<2x16x1xf32>
    %118 = vector.broadcast %117 : vector<2x16x1xf32> to vector<2x16x16xf32>
    %119 = arith.subf %115, %118 : vector<2x16x16xf32>
    %120 = math.exp %119 : vector<2x16x16xf32>
    %cst_44 = arith.constant dense<0.000000e+00> : vector<2x16xf32>
    %121 = vector.multi_reduction <add>, %120, %cst_44 [2] : vector<2x16x16xf32> to vector<2x16xf32>
    %122 = vector.shape_cast %121 : vector<2x16xf32> to vector<2x16x1xf32>
    %123 = arith.truncf %120 : vector<2x16x16xf32> to vector<2x16x16xbf16>
    "tpu.trace_start"() <{level = 10 : i32, message = "bnm,bmd->bnd"}> : () -> ()
    %cst_45 = arith.constant dense<0.000000e+00> : vector<2x16x8xf32>
    %124 = tpu.matmul %123, %109, %cst_45 {dimension_numbers = #tpu.dot_dimension_numbers<[2], [1], [1], [2], [0, 0, 0, 1, 1, 2], [0], [0]>} : vector<2x16x16xbf16>, vector<2x16x8xbf16>, vector<2x16x8xf32> -> vector<2x16x8xf32>
    "tpu.trace_stop"() : () -> ()
    %125 = tpu.reciprocal %122 {approx = true} : vector<2x16x1xf32> -> vector<2x16x1xf32>
    %126 = vector.broadcast %125 : vector<2x16x1xf32> to vector<2x16x8xf32>
    %127 = arith.mulf %124, %126 : vector<2x16x8xf32>
    %128 = vector.shape_cast %127 : vector<2x16x8xf32> to vector<32x8xf32>
    %129 = arith.truncf %128 : vector<32x8xf32> to vector<32x8xbf16>
    %c24 = arith.constant 24 : index
    %c0_46 = arith.constant 0 : index
    %130 = vector.load %arg10[%c24, %c0_46] : memref<32x32xbf16, #tpu.memory_space<vmem>>, vector<8x32xbf16>
    %cst_47 = arith.constant dense<0.000000e+00> : vector<32x32xf32>
    %131 = tpu.matmul %129, %130, %cst_47 {dimension_numbers = #tpu.dot_dimension_numbers<[1], [0], [0], [1], [0, 0, 1, 1], [], []>} : vector<32x8xbf16>, vector<8x32xbf16>, vector<32x32xf32> -> vector<32x32xf32>
    %132 = arith.addf %106, %131 : vector<32x32xf32>
    %c0_48 = arith.constant 0 : index
    %c0_49 = arith.constant 0 : index
    %133 = vector.load %arg11[%c0_48, %c0_49] : memref<1x32xf32, #tpu.memory_space<vmem>>, vector<1x32xf32>
    %134 = vector.broadcast %133 : vector<1x32xf32> to vector<32x32xf32>
    %135 = arith.addf %132, %134 : vector<32x32xf32>
    %136 = vector.shape_cast %135 : vector<32x32xf32> to vector<2x16x32xf32>
    %c0_50 = arith.constant 0 : index
    %c0_51 = arith.constant 0 : index
    %c0_52 = arith.constant 0 : index
    %137 = vector.load %arg12[%c0_50, %c0_51, %c0_52] : memref<2x16x32xf32, #tpu.memory_space<vmem>>, vector<2x16x32xf32>
    tpu.vector_store %arg12[%c0_50, %c0_51, %c0_52], %136 {strides = array<i32>} : memref<2x16x32xf32, #tpu.memory_space<vmem>>, vector<2x16x32xf32>,
    return
  }
  func.func @transform_0(%arg0: i32) -> (i32, i32, i32) {
    %c0_i32 = arith.constant 0 : i32
    %c0_i32_0 = arith.constant 0 : i32
    %c0_i32_1 = arith.constant 0 : i32
    return %arg0, %c0_i32, %c0_i32_0 : i32, i32, i32
  }
  func.func @transform_1(%arg0: i32) -> (i32, i32, i32) {
    %c0_i32 = arith.constant 0 : i32
    %c0_i32_0 = arith.constant 0 : i32
    %c0_i32_1 = arith.constant 0 : i32
    return %arg0, %c0_i32, %c0_i32_0 : i32, i32, i32
  }
  func.func @transform_2(%arg0: i32) -> (i32, i32, i32) {
    %c0_i32 = arith.constant 0 : i32
    %c0_i32_0 = arith.constant 0 : i32
    %c0_i32_1 = arith.constant 0 : i32
    %c0_i32_2 = arith.constant 0 : i32
    return %c0_i32, %c0_i32_0, %c0_i32_1 : i32, i32, i32
  }
  func.func @transform_3(%arg0: i32) -> (i32, i32) {
    %c0_i32 = arith.constant 0 : i32
    %c0_i32_0 = arith.constant 0 : i32
    %c0_i32_1 = arith.constant 0 : i32
    return %c0_i32, %c0_i32_0 : i32, i32
  }
  func.func @transform_4(%arg0: i32) -> (i32, i32) {
    %c0_i32 = arith.constant 0 : i32
    %c0_i32_0 = arith.constant 0 : i32
    %c0_i32_1 = arith.constant 0 : i32
    return %c0_i32, %c0_i32_0 : i32, i32
  }
  func.func @transform_5(%arg0: i32) -> (i32, i32) {
    %c0_i32 = arith.constant 0 : i32
    %c0_i32_0 = arith.constant 0 : i32
    %c0_i32_1 = arith.constant 0 : i32
    return %c0_i32, %c0_i32_0 : i32, i32
  }
  func.func @transform_6(%arg0: i32) -> (i32, i32) {
    %c0_i32 = arith.constant 0 : i32
    %c0_i32_0 = arith.constant 0 : i32
    %c0_i32_1 = arith.constant 0 : i32
    return %c0_i32, %c0_i32_0 : i32, i32
  }
  func.func @transform_7(%arg0: i32) -> (i32, i32) {
    %c0_i32 = arith.constant 0 : i32
    %c0_i32_0 = arith.constant 0 : i32
    %c0_i32_1 = arith.constant 0 : i32
    return %c0_i32, %c0_i32_0 : i32, i32
  }
  func.func @transform_8(%arg0: i32) -> (i32, i32) {
    %c0_i32 = arith.constant 0 : i32
    %c0_i32_0 = arith.constant 0 : i32
    %c0_i32_1 = arith.constant 0 : i32
    return %c0_i32, %c0_i32_0 : i32, i32
  }
  func.func @transform_9(%arg0: i32) -> (i32, i32) {
    %c0_i32 = arith.constant 0 : i32
    %c0_i32_0 = arith.constant 0 : i32
    %c0_i32_1 = arith.constant 0 : i32
    return %c0_i32, %c0_i32_0 : i32, i32
  }
  func.func @transform_10(%arg0: i32) -> (i32, i32) {
    %c0_i32 = arith.constant 0 : i32
    %c0_i32_0 = arith.constant 0 : i32
    %c0_i32_1 = arith.constant 0 : i32
    return %c0_i32, %c0_i32_0 : i32, i32
  }
  func.func @transform_11(%arg0: i32) -> (i32, i32, i32) {
    %c0_i32 = arith.constant 0 : i32
    %c0_i32_0 = arith.constant 0 : i32
    %c0_i32_1 = arith.constant 0 : i32
    return %arg0, %c0_i32, %c0_i32_0 : i32, i32, i32
  }
}

</mosaic_0001>

<bundles_post_ra>
// kernel: tpu_custom_call.1
= control target key start
LH: loop header
LB: loop body
LE: loop exit
PB: predicated region body
PF: predicated region fallthrough
CT: control target
= control target key end

     0   :  { %s3521_s0 = inlined_call_operand.hbm [shape: f32[8,16,32], index: 0, kind: input, shape index: {}]   ;;  %s3522_s1 = inlined_call_operand.hbm [shape: f32[8,16,32], index: 1, kind: input, shape index: {}]   ;;  %s3523_s2 = inlined_call_operand.hbm [shape: f32[4,16,16], index: 2, kind: input, shape index: {}]   ;;  %s3524_s3 = inlined_call_operand.hbm [shape: bf16[32,32], index: 3, kind: input, shape index: {}]   ;;  %s3525_s4 = inlined_call_operand.vmem [shape: f32[1,32], index: 4, kind: input, shape index: {}]   ;;  %s3526_s5 = inlined_call_operand.vmem [shape: bf16[32,32], index: 5, kind: input, shape index: {}]   ;;  %s3527_s6 = inlined_call_operand.vmem [shape: f32[1,32], index: 6, kind: input, shape index: {}]   ;;  %s3528_s7 = inlined_call_operand.hbm [shape: bf16[32,32], index: 7, kind: input, shape index: {}]   ;;  %s3529_s8 = inlined_call_operand.hbm [shape: f32[1,32], index: 8, kind: input, shape index: {}]   ;;  %s3530_s9 = inlined_call_operand.vmem [shape: bf16[32,32], index: 9, kind: input, shape index: {}]   ;;  %s3531_s10 = inlined_call_operand.vmem [shape: f32[1,32], index: 10, kind: input, shape index: {}]   ;;  %s3532_s11 = inlined_call_operand.hbm [shape: f32[8,16,32], index: 11, kind: output, shape index: {}]  }
   0x1   :  { %3543 = sst [smem:[#allocation22_spill]] %s3521_s0 }
   0x2   :  { %3544 = sst [smem:[#allocation23_spill]] %s3523_s2 }
   0x3   :  { %3545 = sst [smem:[#allocation24_spill]] %s3524_s3 }
   0x4   :  { %3546 = sst [smem:[#allocation25_spill]] %s3528_s7 }
   0x5   :  { %3547 = sst [smem:[#allocation26_spill]] %s3531_s10 }
   0x6   :  { %3548 = sst [smem:[#allocation27_spill]] %s3532_s11 }
   0x7   :  { %16 = vsyncpa [#allocation3], 0 }
   0x8   :  { %18 = vsyncpa [#allocation3 + $0x1], 0 }
   0x9   :  { %19 = vsyncpa [#allocation6], 0 }
   0xa   :  { %21 = vsyncpa [#allocation6 + $0x1], 0 }
   0xb   :  { %22 = vsyncpa [#allocation9], 0 }
   0xc   :  { %23 = vsyncpa [#allocation12], 0 }
   0xd   :  { %24 = vsyncpa [#allocation4], 0 }
   0xe   :  { %26 = vsyncpa [#allocation4 + $0x1], 0  ;;  %s2939_s17 = smov 0   ;;  %s2941_s18 = smov 0  }
   0xf   :  { %s2943_s19 = smov 0   ;;  %s2945_s20 = smov 0  }
  0x10 LB: > { %3549 = sst [smem:[#allocation20_spill]] %s2847_s17  ;;  %s2960_s21 = sadd.s32 4294967295, %s2859_s20   ;;  %s2859_s20 = sphi %s2945_s20, %s3581_s20   ;;  %s2855_s19 = sphi %s2943_s19, %s3580_s19   ;;  %s2851_s18 = sphi %s2941_s18, %s3579_s18   ;;  %s2847_s17 = sphi %s2939_s17, %s3578_s17  }
  0x11   : > { %s2141_s22 = sadd.s32 4294967294, %s2859_s20   ;;  %p52_p0 = scmp.ne.s32.totalorder %s2851_s18, %s2847_s17 }
  0x12   : > { %p3533_p1 = scmp.eq.s32.totalorder %s2960_s21, 0  ;;  %p297_p3 = scmp.eq.s32.totalorder %s2141_s22, 3 }
  0x13   : > { %p2142_p5 = scmp.ge.s32.totalorder %s2859_s20, 1  ;;  %p304_p7 = scmp.lt.s32.totalorder %s2859_s20, 5 }
  0x14   : > { %p2969_p4 = por %p3533_p1, %p52_p0  ;;  %p2974_p6 = por %p297_p3, %p52_p0 }
  0x15   : > { %p2979_p8 = pnand %p2142_p5, %p304_p7  ;;  %s2861_s26 = smov [#allocation7]  }
  0x16   : > { %s3550_s23 = scalar_select %p2969_p4, 1, 0 }
  0x17   : > { %s3551_s24 = scalar_select %p2974_p6, 1, 0 }
  0x18   : > { %s3553_s25 = scalar_select %p2979_p8, 1, 0 }
  0x19   : > { %3552 = sst [smem:[#allocation21_spill]] %s3551_s24  ;;  %s316_s27 = sshll.u32 %s2861_s26, 4  ;;  %s317_s27 = int_to_ptr.vmem [resolvable:$true] %s316_s27 }
  0x1a   : > { %p2454_p9 = pneg %p2979_p8  ;;  %s2862_s29 = smov [#allocation8]  }
  0x1b   : > { %s329_s30 = sshll.u32 %s2862_s29, 4  ;;  %s3555_s2 = sld [smem:[#allocation23_spill]]  ;;  %s2991_s30 = int_to_ptr.vmem [resolvable:$true] %s329_s30 }
  0x1c   : > { %p2987_p10 = pnand %p2454_p9, %p3533_p1 }
  0x1e   : > { %p3001_p12 = pneg %p2987_p10 }
  0x21   : > { %s2605_s14 = scalar_lea.hbm %s3555_s2, 1024 }
  0x22   : > { %p2606_p11 = scmp.ne.s32.totalorder %s3555_s2, %s2605_s14  ;;  %p2612_p3 = scmp.lt.u32.totalorder %s2605_s14, %s3555_s2 }
  0x24   : > { %p2608_p13 = pnand %p3001_p12, %p2606_p11 }
  0x26   : > { %p2609_p0 = pneg %p2608_p13 }
  0x28   : > { %p2614_p5 = pnand %p2612_p3, %p2609_p0 }
  0x2a   : > { %2617 = shalt.err (!%p2614_p5)
}
  0x2b   : > { %s2618_s12 = scalar_lea.vmem %s317_s27, 1024  ;;  %p2626_p2 = scmp.lt.s32.totalorder %s317_s27, %s317_s27 }
  0x2c   : > { %p2619_p7 = scmp.ne.s32.totalorder %s317_s27, %s2618_s12  ;;  %p2627_p6 = scmp.lt.s32.totalorder %s2618_s12, %s2618_s12 }
  0x2e   : > { %p2621_p9 = pnand %p2619_p7, %p3001_p12  ;;  %p2628_p4 = por %p2627_p6, %p2626_p2 }
  0x30   : > { %p2622_p1 = pneg %p2621_p9 }
  0x32   : > { %p2629_p8 = pnand %p2628_p4, %p2622_p1 }
  0x34   : > { %2632 = shalt.err (!%p2629_p8)
}
  0x35   : > { %s3539_s13 = smov 128   ;;  %s3541_s15 = smov 8  }
  0x36   : > { %2457 = dma.hbm_to_vmem [thread:$0]  (!%p2987_p10), %s3555_s2, 1024, %s317_s27, [#allocation6], %s3539_s13, %s3539_s13, %s3541_s15  }
  0x37   : > { %s3557_s3 = sld [smem:[#allocation24_spill]] }
  0x3d   : > { %s2633_s24 = scalar_lea.hbm %s3557_s3, 256 }
  0x3e   : > { %p2634_p1 = scmp.ne.s32.totalorder %s3557_s3, %s2633_s24  ;;  %p2640_p6 = scmp.lt.u32.totalorder %s2633_s24, %s3557_s3 }
  0x40   : > { %p2636_p2 = pnand %p2634_p1, %p3001_p12 }
  0x42   : > { %p2637_p4 = pneg %p2636_p2 }
  0x44   : > { %p2642_p8 = pnand %p2640_p6, %p2637_p4 }
  0x46   : > { %2645 = shalt.err (!%p2642_p8)
}
  0x47   : > { %s2646_s27 = scalar_lea.vmem %s2991_s30, 256  ;;  %p2654_p3 = scmp.lt.s32.totalorder %s2991_s30, %s2991_s30 }
  0x48   : > { %p2647_p11 = scmp.ne.s32.totalorder %s2991_s30, %s2646_s27  ;;  %p2655_p5 = scmp.lt.s32.totalorder %s2646_s27, %s2646_s27 }
  0x4a   : > { %p2649_p13 = pnand %p2647_p11, %p3001_p12  ;;  %p2656_p7 = por %p2655_p5, %p2654_p3 }
  0x4c   : > { %p2650_p0 = pneg %p2649_p13 }
  0x4e   : > { %p2657_p9 = pnand %p2656_p7, %p2650_p0 }
  0x50   : > { %2660 = shalt.err (!%p2657_p9)
}
  0x51   : > { %s2865_s17 = smov 64   ;;  %s2866_s10 = smov 4  }
  0x52   : > { %2460 = dma.hbm_to_vmem [thread:$0]  (!%p2987_p10), %s3557_s3, 256, %s2991_s30, [#allocation9], %s2865_s17, %s2865_s17, %s2866_s10  }
  0x53   : > { %s2867_s14 = smov [#allocation10]   ;;  %s2868_s26 = smov [#allocation11]  }
  0x54   : > { %s351_s16 = sshll.u32 %s2867_s14, 4  ;;  %s365_s29 = sshll.u32 %s2868_s26, 4  ;;  %s352_s16 = int_to_ptr.vmem [resolvable:$true] %s351_s16  ;;  %s3043_s29 = int_to_ptr.vmem [resolvable:$true] %s365_s29 }
  0x55   : > { %s3558_s7 = sld [smem:[#allocation25_spill]] }
  0x5b   : > { %s2661_s13 = scalar_lea.hbm %s3558_s7, 256 }
  0x5c   : > { %p2662_p1 = scmp.ne.s32.totalorder %s3558_s7, %s2661_s13  ;;  %p2668_p6 = scmp.lt.u32.totalorder %s2661_s13, %s3558_s7 }
  0x5e   : > { %p2664_p2 = pnand %p2662_p1, %p3001_p12 }
  0x60   : > { %p2665_p4 = pneg %p2664_p2 }
  0x62   : > { %p2670_p8 = pnand %p2668_p6, %p2665_p4 }
  0x64   : > { %2673 = shalt.err (!%p2670_p8)
}
  0x65   : > { %s2674_s24 = scalar_lea.vmem %s352_s16, 256  ;;  %p2682_p3 = scmp.lt.s32.totalorder %s352_s16, %s352_s16 }
  0x66   : > { %p2675_p11 = scmp.ne.s32.totalorder %s352_s16, %s2674_s24  ;;  %p2683_p5 = scmp.lt.s32.totalorder %s2674_s24, %s2674_s24 }
  0x68   : > { %p2677_p13 = pnand %p2675_p11, %p3001_p12  ;;  %p2684_p7 = por %p2683_p5, %p2682_p3 }
  0x6a   : > { %p2678_p0 = pneg %p2677_p13 }
  0x6c   : > { %p2685_p9 = pnand %p2684_p7, %p2678_p0 }
  0x6e   : > { %2688 = shalt.err (!%p2685_p9)
}
  0x6f   : > { %2463 = dma.hbm_to_vmem [thread:$0]  (!%p2987_p10), %s3558_s7, 256, %s352_s16, [#allocation9], %s2865_s17, %s2865_s17, %s2866_s10  }
  0x70   : > { %s2689_s26 = scalar_lea.hbm %s3529_s8, 16 }
  0x71   : > { %p2690_p1 = scmp.ne.s32.totalorder %s3529_s8, %s2689_s26  ;;  %p2696_p6 = scmp.lt.u32.totalorder %s2689_s26, %s3529_s8 }
  0x73   : > { %p2692_p2 = pnand %p2690_p1, %p3001_p12 }
  0x75   : > { %p2693_p4 = pneg %p2692_p2 }
  0x77   : > { %p2698_p8 = pnand %p2696_p6, %p2693_p4 }
  0x79   : > { %2701 = shalt.err (!%p2698_p8)
}
  0x7a   : > { %s2702_s17 = scalar_lea.vmem %s3043_s29, 16  ;;  %s2709_s10 = scalar_lea.vmem %s3043_s29, 32 }
  0x7b   : > { %p2703_p11 = scmp.ne.s32.totalorder %s3043_s29, %s2702_s17  ;;  %p2710_p3 = scmp.lt.s32.totalorder %s3043_s29, %s3043_s29 }
  0x7c   : > { %p2711_p5 = scmp.lt.s32.totalorder %s2709_s10, %s2702_s17 }
  0x7d   : > { %p2705_p13 = pnand %p2703_p11, %p3001_p12 }
  0x7e   : > { %p2712_p7 = por %p2711_p5, %p2710_p3 }
  0x7f   : > { %p2706_p0 = pneg %p2705_p13 }
  0x81   : > { %p2713_p9 = pnand %p2712_p7, %p2706_p0 }
  0x83   : > { %2716 = shalt.err (!%p2713_p9)
}
  0x84   : > { %2466 = dma.hbm_to_vmem [thread:$0]  (!%p2987_p10), %s3529_s8, 16, %s3043_s29, [#allocation12]  }
  0x85   : > { %s3088_s22 = sadd.s32 1, %s2859_s20   ;;  %s39_s2 = sadd.s32 1, %s2855_s19 }
  0x86   : > { %s36_s28 = ssub.s32 %s2859_s20, %s3088_s22  ;;  %p46_p1 = scmp.ne.s32.totalorder %s2855_s19, %s2851_s18 }
  0x87   : > { %p37_p12 = scmp.eq.s32.totalorder %s36_s28, 0  ;;  %p47_p2 = scmp.eq.s32.totalorder %s2859_s20, 0 }
  0x88   : > { %p3559_p6 = scmp.eq.s32.totalorder %s2960_s21, 3  ;;  %p2482_p11 = scmp.lt.s32.totalorder %s2859_s20, 4 }
  0x89   : > { %s3097_s15 = scalar_select %p37_p12, %s2855_s19, %s39_s2  }
  0x8a   : > { %p48_p4 = por %p47_p2, %p46_p1  ;;  %p3101_p8 = por %p3559_p6, %p46_p1 }
  0x8b   : > { %s382_s14 = sand.u32 1, %s2855_s19   ;;  %s2211_s29 = sshll.u32 %s2859_s20, 9 }
  0x8c   : > { %s2148_s26 = sshll.u32 %s382_s14, 5  ;;  %s3561_s0 = sld [smem:[#allocation22_spill]] }
  0x8d   : > { %s386_s30 = scalar_lea.vmem [#allocation2], %s2148_s26  ;;  %p3115_p10 = pnand %p2482_p11, %p48_p4 }
  0x8e   : > { %s394_s17 = sshll.u32 %s386_s30, 4  ;;  %s3122_s28 = scalar_lea.hbm %s3522_s1, %s2211_s29  ;;  %s3113_s17 = int_to_ptr.vmem [resolvable:$true] %s394_s17 }
  0x8f   : > { %s408_s2 = scalar_lea.vmem [#allocation5], %s2148_s26  ;;  %s3126_s27 = scalar_lea.sflag [#allocation3], %s382_s14 }
  0x90   : > { %s3124_s12 = sshll.u32 %s408_s2, 4  ;;  %p2719_p0 = pneg %p3115_p10  ;;  %s3158_s12 = int_to_ptr.vmem [resolvable:$true] %s3124_s12 }
  0x92   : > { %s3111_s11 = scalar_lea.hbm %s3561_s0, %s2211_s29  ;;  %s2722_s16 = scalar_lea.hbm %s3561_s0, 2048 }
  0x93   : > { %s2717_s30 = scalar_lea.hbm %s3111_s11, 512  ;;  %p2723_p7 = scmp.lt.u32.totalorder %s3111_s11, %s3561_s0 }
  0x94   : > { %p2718_p13 = scmp.ne.s32.totalorder %s3111_s11, %s2717_s30  ;;  %p2724_p9 = scmp.lt.u32.totalorder %s2722_s16, %s2717_s30 }
  0x95   : > { %p2726_p1 = scmp.lt.u32.totalorder %s2717_s30, %s3111_s11 }
  0x96   : > { %p2720_p3 = pnand %p2719_p0, %p2718_p13  ;;  %p2725_p12 = por %p2724_p9, %p2723_p7 }
  0x98   : > { %p2721_p5 = pneg %p2720_p3  ;;  %p2727_p2 = por %p2726_p1, %p2725_p12 }
  0x9a   : > { %p2728_p4 = pnand %p2727_p2, %p2721_p5 }
  0x9c   : > { %2731 = shalt.err (!%p2728_p4)
}
  0x9d   : > { %s2732_s14 = scalar_lea.vmem %s3113_s17, 512  ;;  %s2869_s3 = smov [#allocation2]  }
  0x9e   : > { %p2733_p6 = scmp.ne.s32.totalorder %s3113_s17, %s2732_s14  ;;  %s2737_s7 = sshll.u32 %s2869_s3, 4  ;;  %s2738_s7 = int_to_ptr.vmem [resolvable:$false] %s2737_s7 }
  0x9f   : > { %s2739_s26 = scalar_lea.vmem %s2738_s7, 1024  ;;  %p2740_p3 = scmp.lt.s32.totalorder %s3113_s17, %s2738_s7 }
  0xa0   : > { %p2735_p11 = pnand %p2733_p6, %p2719_p0  ;;  %p2741_p7 = scmp.lt.s32.totalorder %s2739_s26, %s2732_s14 }
  0xa2   : > { %p2736_p13 = pneg %p2735_p11  ;;  %p2742_p9 = por %p2741_p7, %p2740_p3 }
  0xa4   : > { %p2743_p12 = pnand %p2742_p9, %p2736_p13 }
  0xa6   : > { %2746 = shalt.err (!%p2743_p12)
}
  0xa7   : > { %s3563_s2 = smov 8   ;;  %s3564_s30 = smov 128  }
  0xa8   : > { %2470 = dma.hbm_to_vmem [thread:$0]  (!%p3115_p10), %s3111_s11, 512, %s3113_s17, %s3126_s27, %s3564_s30, %s3564_s30, %s3563_s2  }
  0xa9   : > { %s404_s16 = sand.u32 1, %s2859_s20   ;;  %s2747_s29 = scalar_lea.hbm %s3122_s28, 512 }
  0xaa   : > { %s3161_s24 = scalar_lea.sflag [#allocation6], %s404_s16  ;;  %p2748_p5 = scmp.ne.s32.totalorder %s3122_s28, %s2747_s29 }
  0xab   : > { %s2752_s7 = scalar_lea.hbm %s3522_s1, 2048  ;;  %p2753_p4 = scmp.lt.u32.totalorder %s3122_s28, %s3522_s1 }
  0xac   : > { %p2750_p1 = pnand %p2748_p5, %p2719_p0  ;;  %p2754_p6 = scmp.lt.u32.totalorder %s2752_s7, %s2747_s29 }
  0xad   : > { %p2756_p13 = scmp.lt.u32.totalorder %s2747_s29, %s3122_s28 }
  0xae   : > { %p2751_p2 = pneg %p2750_p1  ;;  %p2755_p11 = por %p2754_p6, %p2753_p4 }
  0xb0   : > { %p2757_p3 = por %p2756_p13, %p2755_p11 }
  0xb2   : > { %p2758_p7 = pnand %p2757_p3, %p2751_p2 }
  0xb4   : > { %2761 = shalt.err (!%p2758_p7)
}
  0xb5   : > { %s2762_s11 = scalar_lea.vmem %s3158_s12, 512  ;;  %s2870_s17 = smov [#allocation5]  }
  0xb6   : > { %p2763_p9 = scmp.ne.s32.totalorder %s3158_s12, %s2762_s11  ;;  %s2767_s27 = sshll.u32 %s2870_s17, 4  ;;  %s2768_s27 = int_to_ptr.vmem [resolvable:$false] %s2767_s27 }
  0xb7   : > { %s2769_s0 = scalar_lea.vmem %s2768_s27, 1024  ;;  %p2770_p1 = scmp.lt.s32.totalorder %s3158_s12, %s2768_s27 }
  0xb8   : > { %p2765_p12 = pnand %p2763_p9, %p2719_p0  ;;  %p2771_p4 = scmp.lt.s32.totalorder %s2769_s0, %s2762_s11 }
  0xba   : > { %p2766_p5 = pneg %p2765_p12  ;;  %p2772_p6 = por %p2771_p4, %p2770_p1 }
  0xbc   : > { %p2773_p11 = pnand %p2772_p6, %p2766_p5 }
  0xbe   : > { %2776 = shalt.err (!%p2773_p11)
}
  0xbf   : > { %2473 = dma.hbm_to_vmem [thread:$0]  (!%p3115_p10), %s3122_s28, 512, %s3158_s12, %s3161_s24, %s3564_s30, %s3564_s30, %s3563_s2  }
  0xc0   : > { %p3565_p0 = scmp.ne.s32.totalorder %s3553_s25, 0 }
  0xc1   : > { %s3193_s16 = sand.u32 (!%p3565_p0), 1, %s2851_s18   ;;  %p3566_p2 = scmp.ne.s32.totalorder (!%p3565_p0), %s3550_s23, 0 }
  0xc2   : > { %428 = sbr.rel (%p3565_p0) target bundleno = 2659 (0xa63), region = 64  ;;  %s3196_s29 = sshll.u32 (!%p3565_p0), %s3193_s16, 5 }
  0xc3   : > { %s431_s10 = scalar_lea.sflag (!%p3565_p0), [#allocation3], %s3193_s16  ;;  %s3200_s14 = scalar_lea.vmem (!%p3565_p0), [#allocation2], %s3196_s29 }
  0xc9   : > { %2822 = dma.done.wait (%p3566_p2), %s431_s10, 512  }
  0xca   : > { %2824 = vsyncadd (%p3566_p2), %s431_s10, 4294966784  ;;  %s439_s25 = sand.u32 1, %s2960_s21   ;;  %s443_s12 = scalar_lea.vmem [#allocation5], %s3196_s29 }
  0xcb   : > { %s440_s28 = scalar_lea.sflag [#allocation6], %s439_s25 }
  0xcc   : > { %2826 = dma.done.wait (%p3566_p2), %s440_s28, 512  }
  0xcd   : > { %2828 = vsyncadd (%p3566_p2), %s440_s28, 4294966784  ;;  %p3567_p10 = scmp.eq.s32.totalorder %s2960_s21, 0 }
  0xcf   : > { %2830 = dma.done.wait (%p3567_p10), [#allocation6], 1024   ;;  %p3568_p13 = pmov %p3567_p10 }
  0xd0   : > { %p3569_p3 = pmov %p3567_p10 }
  0xd1   : > { %2832 = vsyncadd (%p3568_p13), [#allocation6], 4294966272 }
  0xd2   : > { %2834 = dma.done.wait (%p3569_p3), [#allocation9], 512   ;;  %p3570_p7 = pmov %p3569_p3 }
  0xd3   : > { %p3571_p9 = pmov %p3569_p3 }
  0xd4   : > { %2836 = vsyncadd (%p3570_p7), [#allocation9], 4294966784 }
  0xd5   : > { %2838 = dma.done.wait (%p3571_p9), [#allocation12], 16   ;;  %p3572_p12 = pmov %p3569_p3 }
  0xd6   : > { %v2535_v0 = vld [vmem:[%s3526_s5] sm:$0xff]   ;;  %v2536_v1 = vld [vmem:[%s3526_s5 + $0x8] sm:$0xff]   ;;  %vm542_vm0 = vcmask 261120   ;;  %v515_v5 = vld [vmem:[%s443_s12 + $0x10] sm:$0xff]  ;;  %v2871_v18 = vmov 0.0   ;;  %vm2872_vm1 = vmmov 0  }
  0xd7   : > { %2840 = vsyncadd (%p3572_p12), [#allocation12], 4294967280  ;;  %2280 = vmatprep.subr.bf16.mxu1 %v2535_v0  ;;  %v2537_v2 = vld [vmem:[#allocation8] sm:$0xff]   ;;  %v514_v4 = vld [vmem:[%s443_s12 + $0x8] sm:$0xff]  ;;  %vm762_vm2 = vcmask 64512   ;;  %s2873_s17 = smov 120  }
  0xd8   : > { %2281 = vmatpush3.bf16.msra.mxu1 %v2535_v0  ;;  %v513_v3 = vld [vmem:[%s443_s12] sm:$0xff]  ;;  %2272 = vmatprep.subr.bf16.mxu0 %v2537_v2  ;;  %v516_v7 = vld [vmem:[%s443_s12 + $0x18] sm:$0xff]  ;;  %v2538_v8 = vld [vmem:[#allocation8 + $0x8] sm:$0xff]   ;;  %vm857_vm3 = vcmask 130048   ;;  %s2874_s27 = smov 112   ;;  %vm1252_vm4 = vcmask 1043456  }
  0xd9   : > { %2282 = vmatprep.subr.bf16.mxu1 %v2536_v1  ;;  %v517_v6 = vpack.c.bf16 %v514_v4, %v513_v3  ;;  %2273 = vmatpush3.bf16.msra.mxu0 %v2537_v2  ;;  %v507_v9 = vld [vmem:[%s3200_s14] sm:$0xff]  ;;  %v508_v10 = vld [vmem:[%s3200_s14 + $0x8] sm:$0xff]  ;;  %v518_v11 = vpack.c.bf16 %v516_v7, %v515_v5  ;;  %v509_v13 = vld [vmem:[%s3200_s14 + $0x10] sm:$0xff]  ;;  %s2875_s28 = smov 104   ;;  %s3573_s7 = sld [smem:[#allocation26_spill]] }
  0xda   : > { %v511_v12 = vpack.c.bf16 %v508_v10, %v507_v9  ;;  %v510_v14 = vld [vmem:[%s3200_s14 + $0x18] sm:$0xff]  ;;  %2274 = vmatprep.subr.bf16.mxu0 %v2538_v8  ;;  %v2539_v15 = vld [vmem:[#allocation10] sm:$0xff]   ;;  %v2169_v20 = vld [vmem:[%s3527_s6] ss:$0 sm:$0xff]  ;;  %s502_s26 = scalar_lea.vmem [#allocation13], %s3196_s29  ;;  %s3574_s0 = sld [smem:[#allocation27_spill]] }
  0xdb   : > { %2284 = vmatprep.mubr.msk.bf16.mxu1 %vm542_vm0, %v517_v6  ;;  %v512_v16 = vpack.c.bf16 %v510_v14, %v509_v13  ;;  %v2540_v17 = vld [vmem:[#allocation10 + $0x8] sm:$0xff]   ;;  %v2164_v21 = vld [vmem:[%s3525_s4] ss:$0 sm:$0xff]  ;;  %v755_v56 = vld [vmem:[#allocation7 + $0x8] sm:$0xff]  ;;  %s2007_s11 = sshll.u32 %s502_s26, 4  ;;  %s2876_s25 = smov [#allocation13]   ;;  %s3469_s11 = int_to_ptr.vmem [resolvable:$true] %s2007_s11 }
  0xdc   : > { %2283 = vmatpush3.bf16.msra.mxu1 %v2536_v1  ;;  %2276 = vmatprep.mubr.msk.bf16.mxu0 %vm542_vm0, %v511_v12  ;;  %v2174_v43 = vld [vmem:[#allocation11] ss:$0 sm:$0xff]  ;;  %s2777_s14 = scalar_lea.vmem %s3469_s11, 512 }
  0xdd   : > { %2275 = vmatpush3.bf16.msra.mxu0 %v2538_v8  ;;  %2296 = vmatprep.subr.bf16.mxu1 %v2871_v18  ;;  %v754_v54 = vld [vmem:[#allocation7] sm:$0xff]  ;;  %p2778_p5 = scmp.ne.s32.totalorder %s3469_s11, %s2777_s14 }
  0xde   : > { %2288 = vmatprep.subr.bf16.mxu0 %v2539_v15 }
  0xdf   : > { %2285 = vmatmul.mubr.msk.bf16.vlgmr.msra.gmra.mrb[0].mxu1 %vm542_vm0, %v518_v11  ;;  %p2779_p1 = pnand %p2778_p5, %p3101_p8 }
  0xe0   : > { %2277 = vmatmul.mubr.msk.bf16.vlgmr.msra.gmra.mrb[0].mxu0 %vm542_vm0, %v512_v16  ;;  %2298 = vmatprep.mubr.msk.bf16.mxu1 %vm2872_vm1, %v2871_v18 }
  0xe1   : > { %2289 = vmatpush3.bf16.msra.mxu0 %v2539_v15  ;;  %2292 = vmatprep.mubr.msk.bf16.mxu0 %vm542_vm0, %v517_v6  ;;  %p2780_p4 = pneg %p2779_p1 }
  0xe2   : > { %2290 = vmatprep.subr.bf16.mxu0 %v2540_v17 }
  0xe5   : > { %2291 = vmatpush3.bf16.msra.mxu0 %v2540_v17 }
  0xe6   : > { %2302 = vmatprep.subr.bf16.mxu0 %v2871_v18 }
  0xe8   : > { %2293 = vmatmul.mubr.msk.bf16.vlgmr.msra.gmra.mrb[4].mxu0 %vm542_vm0, %v518_v11 }
  0xe9   : > { %2304 = vmatprep.mubr.msk.bf16.mxu0 %vm2872_vm1, %v2871_v18 }
 0x1b2   : > { %v2286_v19 = vpop.f32.mrb[0].mxu1 }
 0x1b3   : > { %v661_v22 = vpop.f32.mrb[1].mxu1  ;;  %v2278_v24 = vpop.f32.mrb[0].mxu0  ;;  %v670_v25 = vadd.f32 %v2286_v19, %v2169_v20 }
 0x1b4   : > { %v2287_v23 = vpop.f32.mrb[2].mxu1  ;;  %v592_v28 = vadd.f32 %v2278_v24, %v2164_v21  ;;  %v583_v29 = vpop.f32.mrb[1].mxu0  ;;  %v662_v30 = vadd.f32 %v2169_v20, %v661_v22 }
 0x1b5   : > { %v673_v26 = vadd.f32 %v2287_v23, %v2169_v20  ;;  %v664_v27 = vpop.f32.mrb[3].mxu1  ;;  %v584_v32 = vadd.f32 %v2164_v21, %v583_v29  ;;  %v2279_v33 = vpop.f32.mrb[2].mxu0 }
 0x1b6   : > { %v665_v31 = vadd.f32 %v2169_v20, %v664_v27  ;;  %v595_v35 = vadd.f32 %v2279_v33, %v2164_v21  ;;  %v586_v36 = vpop.f32.mrb[3].mxu0 }
 0x1b7   : > { %v3252_v34 = vpack.c.bf16 %v673_v26, %v670_v25  ;;  %v587_v38 = vadd.f32 %v2164_v21, %v586_v36 }
 0x1b8   : > { %v3254_v37 = vpack.c.bf16 %v665_v31, %v662_v30  ;;  %v3258_v39 = vpack.c.bf16 %v595_v35, %v592_v28 }
 0x1b9   : > { %1052 = vrot.lane.b32.xlu1 %v3252_v34, %s2873_s17  ;;  %v814_v40 = vsel %vm762_vm2, %v3252_v34, 0  ;;  %v3262_v41 = vpack.c.bf16 %v587_v38, %v584_v32 }
 0x1ba   : > { %2303 = vmatpush3.bf16.xpose.msra.mxu0 %v814_v40  ;;  %v767_v42 = vsel %vm762_vm2, %v3254_v37, 0 }
 0x1bb   : > { %2297 = vmatpush3.bf16.xpose.msra.mxu1 %v767_v42  ;;  %2314 = vmatprep.subr.bf16.mxu0 %v2871_v18  ;;  %v2294_v44 = vpop.f32.mrb[4].mxu0 }
 0x1bc   : > { %2308 = vmatprep.subr.bf16.mxu1 %v2871_v18  ;;  %v742_v45 = vadd.f32 %v2294_v44, %v2174_v43  ;;  %v733_v46 = vpop.f32.mrb[5].mxu0 }
 0x1bd   : > { %1049 = vrot.lane.b32.xlu1 %v3258_v39, %s2873_s17  ;;  %v734_v47 = vadd.f32 %v2174_v43, %v733_v46  ;;  %v2295_v48 = vpop.f32.mrb[6].mxu0 }
 0x1be   : > { %v745_v49 = vadd.f32 %v2295_v48, %v2174_v43  ;;  %v736_v50 = vpop.f32.mrb[7].mxu0  ;;  %v757_v48 = vld [vmem:[#allocation7 + $0x18] sm:$0xff] }
 0x1bf   : > { %v737_v51 = vadd.f32 %v2174_v43, %v736_v50 }
 0x1c0   : > { %v3272_v52 = vpack.c.bf16 %v745_v49, %v742_v45  ;;  %v756_v45 = vld [vmem:[#allocation7 + $0x10] sm:$0xff] }
 0x1c1   : > { %2305 = vmatmul.mubr.msk.bf16.vlgmr.msra.gmra.mrb[8].mxu0 %vm762_vm2, %v3258_v39  ;;  %v3276_v53 = vpack.c.bf16 %v737_v51, %v734_v47 }
 0x1c2   : > { %2299 = vmatmul.mubr.msk.bf16.vlgmr.msra.gmra.mrb[4].mxu1 %vm762_vm2, %v3262_v41  ;;  %2316 = vmatprep.mubr.msk.bf16.mxu0 %vm2872_vm1, %v2871_v18 }
 0x1c3   : > { %2315 = vmatpush3.bf16.msra.mxu0 %v3272_v52  ;;  %2310 = vmatprep.mubr.msk.bf16.mxu1 %vm2872_vm1, %v2871_v18 }
 0x1c4   : > { %2309 = vmatpush3.bf16.msra.mxu1 %v3276_v53  ;;  %2326 = vmatprep.subr.bf16.mxu0 %v2871_v18 }
 0x1c5   : > { %2320 = vmatprep.subr.bf16.mxu1 %v2871_v18 }
 0x22b   : > { %v1053_v8 = vpop.permute.xlu1 %1052 }
 0x22c   : > { %v1058_v27 = vsel %vm762_vm2, %v1053_v8, 0 }
 0x22f   : > { %v1050_v9 = vpop.permute.xlu1 %1049 }
 0x294   : > { %v850_v55 = vpop.f32.mrb[8].mxu0 }
 0x295   : > { %v851_v57 = vadd.f32 %v850_v55, %v754_v54  ;;  %v803_v58 = vpop.f32.mrb[4].mxu1  ;;  %v2306_v59 = vpop.f32.mrb[9].mxu0 }
 0x296   : > { %v2300_v60 = vpop.f32.mrb[5].mxu1  ;;  %v853_v61 = vpop.f32.mrb[10].mxu0  ;;  %v804_v5 = vadd.f32 %v803_v58, %v754_v54 }
 0x297   : > { %v854_v62 = vadd.f32 %v853_v61, %v755_v56  ;;  %v806_v63 = vpop.f32.mrb[6].mxu1  ;;  %v2307_v0 = vpop.f32.mrb[11].mxu0  ;;  %v864_v1 = vsel %vm857_vm3, %v851_v57, -inf }
 0x298   : > { %v807_v2 = vadd.f32 %v806_v63, %v755_v56  ;;  %865 = vmax.xlane.f32.xlu0 %v864_v1  ;;  %v2301_v3 = vpop.f32.mrb[7].mxu1  ;;  %v858_v7 = vsel %vm857_vm3, %v804_v5, -inf }
 0x299   : > { %v867_v6 = vsel %vm857_vm3, %v854_v62, -inf }
 0x29a   : > { %v861_v4 = vsel %vm857_vm3, %v807_v2, -inf }
 0x29b   : > { %862 = vmax.xlane.f32.xlu1 %v861_v4 }
 0x29c   : > { %868 = vmax.xlane.f32.xlu0 %v867_v6 }
 0x2a0   : > { %859 = vmax.xlane.f32.xlu0 %v858_v7 }
 0x2ac   : > { %1188 = vrot.lane.b32.xlu1 %v3272_v52, %s2873_s17 }
 0x2b6   : > { %999 = vrot.lane.b32.xlu0 %v3254_v37, %s2873_s17 }
 0x2ba   : > { %996 = vrot.lane.b32.xlu0 %v3262_v41, %s2873_s17 }
 0x325   : > { %v866_v10 = vpop.xlane.xlu0 %865 }
 0x326   : > { %v872_v11 = vsub.f32 %v851_v57, %v866_v10 }
 0x328   : > { %v863_v12 = vpop.xlane.xlu1 %862  ;;  %v878_v13 = vmul.f32 1.442695, %v872_v11 }
 0x329   : > { %v871_v14 = vsub.f32 %v807_v2, %v863_v12  ;;  %v869_v15 = vpop.xlane.xlu0 %868 }
 0x32a   : > { %v873_v16 = vsub.f32 %v854_v62, %v869_v15  ;;  %2541 = vpow2.f32 %v878_v13 }
 0x32b   : > { %v876_v19 = vmul.f32 1.442695, %v871_v14 }
 0x32c   : > { %v880_v17 = vmul.f32 1.442695, %v873_v16  ;;  %v1189_v32 = vpop.permute.xlu1 %1188 }
 0x32d   : > { %v860_v20 = vpop.xlane.xlu0 %859 }
 0x32e   : > { %2543 = vpow2.f32 %v880_v17  ;;  %v870_v21 = vsub.f32 %v804_v5, %v860_v20 }
 0x32f   : > { %2545 = vpow2.f32 %v876_v19 }
 0x330   : > { %v874_v22 = vmul.f32 1.442695, %v870_v21 }
 0x331   : > { %v1000_v29 = vpop.permute.xlu0 %999 }
 0x332   : > { %2547 = vpow2.f32 %v874_v22  ;;  %v1005_v31 = vsel %vm762_vm2, %v1000_v29, 0 }
 0x334   : > { %v3296_v23 = vpop.eup %2541 }
 0x335   : > { %v997_v33 = vpop.permute.xlu0 %996 }
 0x338   : > { %v3298_v24 = vpop.eup %2543 }
 0x339   : > { %v895_v25 = vpack.c.bf16 %v3298_v24, %v3296_v23  ;;  %v3302_v26 = vpop.eup %2545 }
 0x33b   : > { %2317 = vmatmul.mubr.msk.bf16.vlgmr.msra.gmra.mrb[12].mxu0 %vm857_vm3, %v895_v25 }
 0x33c   : > { %v3306_v28 = vpop.eup %2547  ;;  %2327 = vmatpush3.bf16.xpose.msra.mxu0 %v1058_v27  ;;  %2328 = vmatprep.mubr.msk.bf16.mxu0 %vm2872_vm1, %v2871_v18 }
 0x33d   : > { %v894_v30 = vpack.c.bf16 %v3302_v26, %v3306_v28  ;;  %2338 = vmatprep.subr.bf16.mxu0 %v2871_v18 }
 0x33f   : > { %2311 = vmatmul.mubr.msk.bf16.vlgmr.msra.gmra.mrb[8].mxu1 %vm857_vm3, %v894_v30 }
 0x340   : > { %2321 = vmatpush3.bf16.xpose.msra.mxu1 %v1005_v31  ;;  %2322 = vmatprep.mubr.msk.bf16.mxu1 %vm2872_vm1, %v2871_v18 }
 0x341   : > { %2332 = vmatprep.subr.bf16.mxu1 %v2871_v18 }
 0x343   : > { %2329 = vmatmul.mubr.msk.bf16.vlgmr.msra.gmra.mrb[16].mxu0 %vm762_vm2, %v1050_v9 }
 0x344   : > { %2339 = vmatpush3.bf16.msra.mxu0 %v1189_v32  ;;  %2340 = vmatprep.mubr.msk.bf16.mxu0 %vm2872_vm1, %v2871_v18 }
 0x345   : > { %2356 = vmatprep.subr.bf16.mxu0 %v2871_v18 }
 0x347   : > { %2323 = vmatmul.mubr.msk.bf16.vlgmr.msra.gmra.mrb[12].mxu1 %vm762_vm2, %v997_v33 }
 0x348   : > { %2334 = vmatprep.mubr.msk.bf16.mxu1 %vm2872_vm1, %v2871_v18 }
 0x40e   : > { %v3325_v35 = vpop.f32.mrb[12].mxu0 }
 0x40f   : > { %v2318_v36 = vpop.f32.mrb[13].mxu0 }
 0x410   : > { %v3327_v38 = vpop.f32.mrb[14].mxu0 }
 0x411   : > { %v2319_v40 = vpop.f32.mrb[15].mxu0 }
 0x412   : > { %v3329_v42 = vpop.f32.mrb[8].mxu1  ;;  %v882_v40 = vsel %vm857_vm3, %v3306_v28, 0.0 }
 0x413   : > { %v2312_v43 = vpop.f32.mrb[9].mxu1 }
 0x414   : > { %v3331_v44 = vpop.f32.mrb[10].mxu1  ;;  %v885_v43 = vsel %vm857_vm3, %v3302_v26, 0.0  ;;  %v1245_v26 = vld [vmem:[%s3530_s9 + $0x4] sm:$0xf] }
 0x415   : > { %v2313_v46 = vpop.f32.mrb[11].mxu1 }
 0x416   : > { %v1094_v47 = vpop.f32.mrb[16].mxu0  ;;  %v891_v46 = vsel %vm857_vm3, %v3298_v24, 0.0  ;;  %v3384_v24 = vld [vmem:[%s3530_s9] sm:$0xf] }
 0x417   : > { %v1095_v49 = vadd.f32 %v1094_v47, %v756_v45  ;;  %v2330_v50 = vpop.f32.mrb[17].mxu0 }
 0x418   : > { %v1097_v51 = vpop.f32.mrb[18].mxu0 }
 0x419   : > { %v1098_v54 = vadd.f32 %v1097_v51, %v757_v48  ;;  %v2331_v55 = vpop.f32.mrb[19].mxu0  ;;  %v1107_v56 = vsel %vm857_vm3, %v1095_v49, -inf }
 0x41a   : > { %1108 = vmax.xlane.f32.xlu0 %v1107_v56  ;;  %v1041_v57 = vpop.f32.mrb[12].mxu1 }
 0x41b   : > { %v2324_v58 = vpop.f32.mrb[13].mxu1  ;;  %v1110_v59 = vsel %vm857_vm3, %v1098_v54, -inf  ;;  %v1042_v0 = vadd.f32 %v1041_v57, %v756_v45  ;;  %v888_v45 = vsel %vm857_vm3, %v3296_v23, 0.0  ;;  %v1254_v23 = vsel %vm1252_vm4, %v1245_v26, 0 }
 0x41c   : > { %1111 = vmax.xlane.f32.xlu1 %v1110_v59  ;;  %v1044_v60 = vpop.f32.mrb[14].mxu1 }
 0x41d   : > { %v2325_v61 = vpop.f32.mrb[15].mxu1  ;;  %v1045_v62 = vadd.f32 %v1044_v60, %v757_v48  ;;  %v1101_v1 = vsel %vm857_vm3, %v1042_v0, -inf }
 0x41f   : > { %v1104_v63 = vsel %vm857_vm3, %v1045_v62, -inf }
 0x42d   : > { %1365 = vrot.lane.b32.xlu1 %v3254_v37, %s2874_s27 }
 0x430   : > { %1363 = vrot.lane.b32.xlu0 %v3262_v41, %s2874_s27 }
 0x431   : > { %1416 = vrot.lane.b32.xlu1 %v3252_v34, %s2874_s27 }
 0x435   : > { %1414 = vrot.lane.b32.xlu1 %v3258_v39, %s2874_s27 }
 0x44f   : > { %1105 = vmax.xlane.f32.xlu0 %v1104_v63 }
 0x459   : > { %1102 = vmax.xlane.f32.xlu1 %v1101_v1 }
 0x46a   : > { %1140 = vrot.lane.b32.xlu1 %v3276_v53, %s2873_s17  ;;  %s2215_s17 = sshll.u32 %s2960_s21, 9  ;;  %s1993_s21 = scalar_lea.sflag [#allocation4], %s3193_s16 }
 0x46b   : > { %s3475_s10 = scalar_lea.hbm %s3574_s0, %s2215_s17 }
 0x4a7   : > { %v1109_v2 = vpop.xlane.xlu0 %1108 }
 0x4a8   : > { %v1115_v3 = vsub.f32 %v1095_v49, %v1109_v2  ;;  %v758_v2 = vld [vmem:[#allocation7 + $0x20] sm:$0xff] }
 0x4a9   : > { %v1112_v4 = vpop.xlane.xlu1 %1111 }
 0x4aa   : > { %v1121_v5 = vmul.f32 1.442695, %v1115_v3  ;;  %v1116_v6 = vsub.f32 %v1098_v54, %v1112_v4 }
 0x4ab   : > { %v1364_v16 = vpop.permute.xlu0 %1363 }
 0x4ac   : > { %2549 = vpow2.f32 %v1121_v5  ;;  %v1123_v7 = vmul.f32 1.442695, %v1116_v6  ;;  %v759_v5 = vld [vmem:[#allocation7 + $0x28] sm:$0xff] }
 0x4ad   : > { %v1366_v11 = vpop.permute.xlu1 %1365 }
 0x4ae   : > { %2551 = vpow2.f32 %v1123_v7  ;;  %v1371_v14 = vsel %vm762_vm2, %v1366_v11, 0 }
 0x4b1   : > { %v1417_v15 = vpop.permute.xlu1 %1416 }
 0x4b2   : > { %v1422_v17 = vsel %vm762_vm2, %v1417_v15, 0 }
 0x4b5   : > { %v1415_v19 = vpop.permute.xlu1 %1414 }
 0x4b6   : > { %v2550_v8 = vpop.eup %2549 }
 0x4b7   : > { %v1131_v9 = vsel %vm857_vm3, %v2550_v8, 0.0 }
 0x4b8   : > { %v2552_v10 = vpop.eup %2551  ;;  %1132 = vadd.xlane.f32.xlu0 %v1131_v9 }
 0x4b9   : > { %v1134_v12 = vsel %vm857_vm3, %v2552_v10, 0.0  ;;  %v1138_v13 = vpack.c.bf16 %v2552_v10, %v2550_v8 }
 0x4ba   : > { %1135 = vadd.xlane.f32.xlu1 %v1134_v12 }
 0x4bb   : > { %2341 = vmatmul.mubr.msk.bf16.vlgmr.msra.gmra.mrb[20].mxu0 %vm857_vm3, %v1138_v13 }
 0x4bc   : > { %2357 = vmatpush3.bf16.xpose.msra.mxu0 %v1371_v14  ;;  %2358 = vmatprep.mubr.msk.bf16.mxu0 %vm2872_vm1, %v2871_v18 }
 0x4bd   : > { %2362 = vmatprep.subr.bf16.mxu0 %v2871_v18 }
 0x4c3   : > { %2359 = vmatmul.mubr.msk.bf16.vlgmr.msra.gmra.mrb[24].mxu0 %vm762_vm2, %v1364_v16 }
 0x4c4   : > { %2363 = vmatpush3.bf16.xpose.msra.mxu0 %v1422_v17  ;;  %2364 = vmatprep.mubr.msk.bf16.mxu0 %vm2872_vm1, %v2871_v18 }
 0x4c5   : > { %2374 = vmatprep.subr.bf16.mxu0 %v2871_v18 }
 0x4cb   : > { %2365 = vmatmul.mubr.msk.bf16.vlgmr.msra.gmra.mrb[28].mxu0 %vm762_vm2, %v1415_v19  ;;  %1550 = vrot.lane.b32.xlu1 %v3272_v52, %s2874_s27 }
 0x4cc   : > { %2376 = vmatprep.mubr.msk.bf16.mxu0 %vm2872_vm1, %v2871_v18 }
 0x4dc   : > { %v1106_v20 = vpop.xlane.xlu0 %1105 }
 0x4dd   : > { %v1114_v21 = vsub.f32 %v1045_v62, %v1106_v20 }
 0x4df   : > { %v1119_v22 = vmul.f32 1.442695, %v1114_v21 }
 0x4e1   : > { %2553 = vpow2.f32 %v1119_v22 }
 0x4e6   : > { %v1103_v25 = vpop.xlane.xlu1 %1102 }
 0x4e7   : > { %v1113_v27 = vsub.f32 %v1042_v0, %v1103_v25 }
 0x4e9   : > { %v1117_v29 = vmul.f32 1.442695, %v1113_v27 }
 0x4ea   : > { %v1141_v30 = vpop.permute.xlu1 %1140 }
 0x4eb   : > { %2555 = vpow2.f32 %v1117_v29  ;;  %2333 = vmatpush3.bf16.msra.mxu1 %v1141_v30  ;;  %v2554_v31 = vpop.eup %2553 }
 0x4ec   : > { %v1128_v47 = vsel %vm857_vm3, %v2554_v31, 0.0  ;;  %2428 = vmatprep.subr.msk.bf16.mxu1 %vm1252_vm4, %v1245_v26 }
 0x4f5   : > { %v2556_v32 = vpop.eup %2555 }
 0x4f6   : > { %v1125_v33 = vsel %vm857_vm3, %v2556_v32, 0.0  ;;  %v1137_v36 = vpack.c.bf16 %v2554_v31, %v2556_v32 }
 0x4f7   : > { %1126 = vadd.xlane.f32.xlu0 %v1125_v33 }
 0x4f8   : > { %2335 = vmatmul.mubr.msk.bf16.vlgmr.msra.gmra.mrb[16].mxu1 %vm857_vm3, %v1137_v36 }
 0x4f9   : > { %2345 = vmatpush3.bf16.msra.mxu1 %v1254_v23 }
 0x4fa   : > { %2429 = vmatprep.subr.msk.bf16.mxu1 %vm1252_vm4, %v3384_v24 }
 0x4fb   : > { %883 = vadd.xlane.f32.xlu0 %v882_v40 }
 0x4ff   : > { %886 = vadd.xlane.f32.xlu0 %v885_v43 }
 0x503   : > { %889 = vadd.xlane.f32.xlu0 %v888_v45 }
 0x507   : > { %892 = vadd.xlane.f32.xlu0 %v891_v46 }
 0x50b   : > { %1129 = vadd.xlane.f32.xlu0 %v1128_v47 }
 0x545   : > { %v1133_v28 = vpop.xlane.xlu0 %1132 }
 0x546   : > { %2557 = vrcp.f32 %v1133_v28 }
 0x547   : > { %v1136_v48 = vpop.xlane.xlu1 %1135 }
 0x548   : > { %2559 = vrcp.f32 %v1136_v48 }
 0x54b   : > { %v1551_v49 = vpop.permute.xlu1 %1550 }
 0x54c   : > { %2375 = vmatpush3.bf16.msra.mxu0 %v1551_v49  ;;  %v1312_v49 = vsel %vm1252_vm4, %v3384_v24, 0 }
 0x54d   : > { %2386 = vmatprep.subr.bf16.mxu0 %v2871_v18 }
 0x550   : > { %v2558_v56 = vpop.eup %2557 }
 0x552   : > { %v2560_v58 = vpop.eup %2559 }
 0x584   : > { %v1127_v50 = vpop.xlane.xlu0 %1126 }
 0x588   : > { %v884_v51 = vpop.xlane.xlu0 %883 }
 0x589   : > { %2561 = vrcp.f32 %v884_v51 }
 0x58c   : > { %v887_v54 = vpop.xlane.xlu0 %886 }
 0x58d   : > { %2563 = vrcp.f32 %v887_v54 }
 0x58e   : > { %v1228_v55 = vpop.f32.mrb[20].mxu0 }
 0x58f   : > { %v2342_v57 = vpop.f32.mrb[21].mxu0  ;;  %v1241_v61 = vmul.f32 %v2558_v56, %v1228_v55 }
 0x590   : > { %v1231_v59 = vpop.f32.mrb[22].mxu0  ;;  %v890_v60 = vpop.xlane.xlu0 %889 }
 0x591   : > { %v1242_v62 = vmul.f32 %v2560_v58, %v1231_v59  ;;  %v2343_v63 = vpop.f32.mrb[23].mxu0  ;;  %2565 = vrcp.f32 %v890_v60 }
 0x593   : > { %v1244_v0 = vpack.c.bf16 %v1242_v62, %v1241_v61  ;;  %v2562_v3 = vpop.eup %2561 }
 0x594   : > { %v893_v1 = vpop.xlane.xlu0 %892  ;;  %v988_v10 = vmul.f32 %v2562_v3, %v3329_v42 }
 0x595   : > { %2567 = vrcp.f32 %v893_v1 }
 0x596   : > { %v1407_v4 = vpop.f32.mrb[24].mxu0  ;;  %2569 = vrcp.f32 %v1127_v50 }
 0x597   : > { %v2564_v6 = vpop.eup %2563  ;;  %v1408_v7 = vadd.f32 %v1407_v4, %v758_v2  ;;  %v2360_v8 = vpop.f32.mrb[25].mxu0 }
 0x598   : > { %v1410_v9 = vpop.f32.mrb[26].mxu0  ;;  %v989_v11 = vmul.f32 %v2564_v6, %v3331_v44  ;;  %v1130_v33 = vpop.xlane.xlu0 %1129 }
 0x599   : > { %v1411_v12 = vadd.f32 %v1410_v9, %v759_v5  ;;  %v2361_v13 = vpop.f32.mrb[27].mxu0  ;;  %v1465_v14 = vsel %vm857_vm3, %v1408_v7, -inf  ;;  %2571 = vrcp.f32 %v1130_v33 }
 0x59a   : > { %1466 = vmax.xlane.f32.xlu0 %v1465_v14  ;;  %v992_v15 = vpack.c.bf16 %v989_v11, %v988_v10 }
 0x59b   : > { %v2566_v16 = vpop.eup %2565  ;;  %v1468_v17 = vsel %vm857_vm3, %v1411_v12, -inf }
 0x59c   : > { %v990_v25 = vmul.f32 %v2566_v16, %v3325_v35 }
 0x59e   : > { %v1458_v19 = vpop.f32.mrb[28].mxu0  ;;  %1469 = vmax.xlane.f32.xlu0 %v1468_v17 }
 0x59f   : > { %v2568_v20 = vpop.eup %2567  ;;  %v1459_v21 = vadd.f32 %v1458_v19, %v758_v2  ;;  %v2366_v22 = vpop.f32.mrb[29].mxu0 }
 0x5a0   : > { %v991_v42 = vmul.f32 %v2568_v20, %v3327_v38  ;;  %v1461_v27 = vpop.f32.mrb[30].mxu0  ;;  %v2570_v35 = vpop.eup %2569 }
 0x5a1   : > { %v1462_v44 = vadd.f32 %v1461_v27, %v759_v5  ;;  %v2367_v29 = vpop.f32.mrb[31].mxu0  ;;  %v1471_v30 = vsel %vm857_vm3, %v1459_v21, -inf }
 0x5a2   : > { %1472 = vmax.xlane.f32.xlu0 %v1471_v30  ;;  %v993_v31 = vpack.c.bf16 %v991_v42, %v990_v25 }
 0x5a3   : > { %v1474_v32 = vsel %vm857_vm3, %v1462_v44, -inf  ;;  %v2572_v38 = vpop.eup %2571 }
 0x5a6   : > { %1475 = vmax.xlane.f32.xlu0 %v1474_v32 }
 0x5bc   : > { %1503 = vrot.lane.b32.xlu0 %v3276_v53, %s2874_s27 }
 0x5cb   : > { %v1180_v36 = vpop.f32.mrb[16].mxu1 }
 0x5cc   : > { %v2336_v40 = vpop.f32.mrb[17].mxu1  ;;  %v1239_v45 = vmul.f32 %v2570_v35, %v1180_v36 }
 0x5cd   : > { %v1183_v43 = vpop.f32.mrb[18].mxu1  ;;  %v760_v40 = vld [vmem:[#allocation7 + $0x30] sm:$0xff] }
 0x5ce   : > { %v1240_v46 = vmul.f32 %v2572_v38, %v1183_v43  ;;  %v2337_v47 = vpop.f32.mrb[19].mxu1  ;;  %v761_v43 = vld [vmem:[#allocation7 + $0x38] sm:$0xff] }
 0x5d0   : > { %v1243_v48 = vpack.c.bf16 %v1240_v46, %v1239_v45 }
 0x5d2   : > { %2346 = vmatprep.mubr.msk.bf16.mxu1 %vm762_vm2, %v1243_v48 }
 0x5d3   : > { %2347 = vmatmul.mubr.msk.bf16.vlgmr.msra.gmra.mrb[20].mxu1 %vm762_vm2, %v1244_v0 }
 0x5d4   : > { %2352 = vmatprep.mubr.msk.bf16.mxu1 %vm762_vm2, %v992_v15  ;;  %2351 = vmatpush3.bf16.msra.mxu1 %v1312_v49 }
 0x5d5   : > { %2368 = vmatprep.subr.bf16.mxu1 %v2871_v18 }
 0x5df   : > { %2353 = vmatmul.mubr.msk.bf16.vlgmr.msra.gmra.mrb[20].mxu1 %vm762_vm2, %v993_v31 }
 0x5e0   : > { %2370 = vmatprep.mubr.msk.bf16.mxu1 %vm2872_vm1, %v2871_v18 }
 0x627   : > { %v1467_v26 = vpop.xlane.xlu0 %1466 }
 0x628   : > { %v1477_v23 = vsub.f32 %v1408_v7, %v1467_v26  ;;  %v1607_v7 = vld [vmem:[%s3530_s9 + $0x8] sm:$0xf] }
 0x62a   : > { %v1481_v28 = vmul.f32 1.442695, %v1477_v23 }
 0x62b   : > { %v1470_v50 = vpop.xlane.xlu0 %1469 }
 0x62c   : > { %2573 = vpow2.f32 %v1481_v28  ;;  %v1478_v24 = vsub.f32 %v1411_v12, %v1470_v50 }
 0x62e   : > { %v1483_v51 = vmul.f32 1.442695, %v1478_v24 }
 0x62f   : > { %v1473_v54 = vpop.xlane.xlu0 %1472 }
 0x630   : > { %2575 = vpow2.f32 %v1483_v51  ;;  %v1479_v55 = vsub.f32 %v1459_v21, %v1473_v54 }
 0x632   : > { %v1485_v56 = vmul.f32 1.442695, %v1479_v55 }
 0x633   : > { %v1476_v57 = vpop.xlane.xlu0 %1475 }
 0x634   : > { %2577 = vpow2.f32 %v1485_v56  ;;  %v1480_v58 = vsub.f32 %v1462_v44, %v1476_v57 }
 0x636   : > { %v2574_v59 = vpop.eup %2573  ;;  %v1487_v60 = vmul.f32 1.442695, %v1480_v58 }
 0x637   : > { %v1504_v61 = vpop.permute.xlu0 %1503  ;;  %v1489_v62 = vsel %vm857_vm3, %v2574_v59, 0.0 }
 0x638   : > { %2579 = vpow2.f32 %v1487_v60  ;;  %1490 = vadd.xlane.f32.xlu1 %v1489_v62  ;;  %2369 = vmatpush3.bf16.msra.mxu1 %v1504_v61 }
 0x639   : > { %2430 = vmatprep.subr.msk.bf16.mxu1 %vm1252_vm4, %v1607_v7 }
 0x63a   : > { %v2576_v63 = vpop.eup %2575 }
 0x63b   : > { %v1492_v0 = vsel %vm857_vm3, %v2576_v63, 0.0  ;;  %v1501_v1 = vpack.c.bf16 %v2576_v63, %v2574_v59 }
 0x63c   : > { %1493 = vadd.xlane.f32.xlu0 %v1492_v0 }
 0x63d   : > { %2371 = vmatmul.mubr.msk.bf16.vlgmr.msra.gmra.mrb[24].mxu1 %vm857_vm3, %v1501_v1 }
 0x63e   : > { %v2578_v2 = vpop.eup %2577 }
 0x63f   : > { %v1495_v3 = vsel %vm857_vm3, %v2578_v2, 0.0 }
 0x640   : > { %1496 = vadd.xlane.f32.xlu0 %v1495_v3 }
 0x642   : > { %v2580_v4 = vpop.eup %2579 }
 0x643   : > { %v1502_v5 = vpack.c.bf16 %v2580_v4, %v2578_v2  ;;  %v1498_v6 = vsel %vm857_vm3, %v2580_v4, 0.0 }
 0x645   : > { %2377 = vmatmul.mubr.msk.bf16.vlgmr.msra.gmra.mrb[32].mxu0 %vm857_vm3, %v1502_v5 }
 0x646   : > { %2388 = vmatprep.mubr.msk.bf16.mxu0 %vm2872_vm1, %v2871_v18 }
 0x649   : > { %1723 = vrot.lane.b32.xlu1 %v3252_v34, %s2875_s28  ;;  %v1615_v34 = vsel %vm1252_vm4, %v1607_v7, 0 }
 0x64a   : > { %2381 = vmatpush3.bf16.msra.mxu1 %v1615_v34 }
 0x64b   : > { %2392 = vmatprep.subr.bf16.mxu1 %v2871_v18 }
 0x656   : > { %1672 = vrot.lane.b32.xlu0 %v3254_v37, %s2875_s28 }
 0x66d   : > { %1499 = vadd.xlane.f32.xlu1 %v1498_v6 }
 0x67e   : > { %1670 = vrot.lane.b32.xlu1 %v3262_v41, %s2875_s28 }
 0x682   : > { %1721 = vrot.lane.b32.xlu1 %v3258_v39, %s2875_s28 }
 0x6c5   : > { %v1491_v39 = vpop.xlane.xlu1 %1490 }
 0x6c6   : > { %2581 = vrcp.f32 %v1491_v39 }
 0x6c9   : > { %v1494_v37 = vpop.xlane.xlu0 %1493  ;;  %v1724_v41 = vpop.permute.xlu1 %1723 }
 0x6ca   : > { %2583 = vrcp.f32 %v1494_v37  ;;  %v1729_v36 = vsel %vm762_vm2, %v1724_v41, 0 }
 0x6cd   : > { %v1497_v8 = vpop.xlane.xlu0 %1496 }
 0x6ce   : > { %2585 = vrcp.f32 %v1497_v8 }
 0x6d0   : > { %v2582_v14 = vpop.eup %2581 }
 0x6d1   : > { %v1673_v9 = vpop.permute.xlu0 %1672 }
 0x6d2   : > { %v1678_v10 = vsel %vm762_vm2, %v1673_v9, 0 }
 0x6d3   : > { %2387 = vmatpush3.bf16.xpose.msra.mxu0 %v1678_v10 }
 0x6d4   : > { %2398 = vmatprep.subr.bf16.mxu0 %v2871_v18  ;;  %v2584_v16 = vpop.eup %2583 }
 0x6d8   : > { %v2586_v25 = vpop.eup %2585 }
 0x6fa   : > { %v1500_v11 = vpop.xlane.xlu1 %1499 }
 0x6fb   : > { %2587 = vrcp.f32 %v1500_v11  ;;  %v1914_v11 = vld [vmem:[%s3530_s9 + $0xc] sm:$0xf] }
 0x6fe   : > { %v1671_v12 = vpop.permute.xlu1 %1670 }
 0x6ff   : > { %2389 = vmatmul.mubr.msk.bf16.vlgmr.msra.gmra.mrb[36].mxu0 %vm762_vm2, %v1671_v12  ;;  %v1922_v12 = vsel %vm1252_vm4, %v1914_v11, 0 }
 0x700   : > { %2400 = vmatprep.mubr.msk.bf16.mxu0 %vm2872_vm1, %v2871_v18 }
 0x702   : > { %v1722_v35 = vpop.permute.xlu1 %1721 }
 0x705   : > { %v2588_v29 = vpop.eup %2587 }
 0x710   : > { %v1543_v13 = vpop.f32.mrb[24].mxu1 }
 0x711   : > { %v2372_v15 = vpop.f32.mrb[25].mxu1  ;;  %v1601_v19 = vmul.f32 %v2582_v14, %v1543_v13 }
 0x712   : > { %v1546_v17 = vpop.f32.mrb[26].mxu1 }
 0x713   : > { %v1602_v20 = vmul.f32 %v2584_v16, %v1546_v17  ;;  %v2373_v21 = vpop.f32.mrb[27].mxu1 }
 0x715   : > { %v1605_v22 = vpack.c.bf16 %v1602_v20, %v1601_v19 }
 0x717   : > { %2382 = vmatprep.mubr.msk.bf16.mxu1 %vm762_vm2, %v1605_v22 }
 0x718   : > { %v1590_v42 = vpop.f32.mrb[32].mxu0 }
 0x719   : > { %v1603_v27 = vmul.f32 %v2586_v25, %v1590_v42  ;;  %v2378_v44 = vpop.f32.mrb[33].mxu0 }
 0x71a   : > { %v1593_v30 = vpop.f32.mrb[34].mxu0 }
 0x71b   : > { %v1604_v31 = vmul.f32 %v2588_v29, %v1593_v30  ;;  %v2379_v32 = vpop.f32.mrb[35].mxu0 }
 0x71d   : > { %v1606_v33 = vpack.c.bf16 %v1604_v31, %v1603_v27 }
 0x71f   : > { %2383 = vmatmul.mubr.msk.bf16.vlgmr.msra.gmra.mrb[20].mxu1 %vm762_vm2, %v1606_v33 }
 0x720   : > { %2393 = vmatpush3.bf16.xpose.msra.mxu1 %v1729_v36  ;;  %2394 = vmatprep.mubr.msk.bf16.mxu1 %vm2872_vm1, %v2871_v18 }
 0x721   : > { %2404 = vmatprep.subr.bf16.mxu1 %v2871_v18 }
 0x727   : > { %2395 = vmatmul.mubr.msk.bf16.vlgmr.msra.gmra.mrb[28].mxu1 %vm762_vm2, %v1722_v35 }
 0x728   : > { %2406 = vmatprep.mubr.msk.bf16.mxu1 %vm2872_vm1, %v2871_v18 }
 0x7d2   : > { %v1714_v38 = vpop.f32.mrb[36].mxu0 }
 0x7d3   : > { %v1715_v45 = vadd.f32 %v1714_v38, %v760_v40  ;;  %v2390_v46 = vpop.f32.mrb[37].mxu0 }
 0x7d4   : > { %v1717_v47 = vpop.f32.mrb[38].mxu0 }
 0x7d5   : > { %v1718_v48 = vadd.f32 %v1717_v47, %v761_v43  ;;  %v2391_v49 = vpop.f32.mrb[39].mxu0  ;;  %v1772_v26 = vsel %vm857_vm3, %v1715_v45, -inf }
 0x7d6   : > { %1773 = vmax.xlane.f32.xlu0 %v1772_v26 }
 0x7d7   : > { %v1775_v23 = vsel %vm857_vm3, %v1718_v48, -inf }
 0x7d8   : > { %1776 = vmax.xlane.f32.xlu1 %v1775_v23 }
 0x7e9   : > { %1857 = vrot.lane.b32.xlu1 %v3272_v52, %s2875_s28 }
 0x7fa   : > { %v1765_v28 = vpop.f32.mrb[28].mxu1 }
 0x7fb   : > { %v1766_v50 = vadd.f32 %v1765_v28, %v760_v40  ;;  %v2396_v18 = vpop.f32.mrb[29].mxu1 }
 0x7fc   : > { %v1768_v24 = vpop.f32.mrb[30].mxu1 }
 0x7fd   : > { %v1769_v51 = vadd.f32 %v1768_v24, %v761_v43  ;;  %v2397_v54 = vpop.f32.mrb[31].mxu1  ;;  %v1778_v55 = vsel %vm857_vm3, %v1766_v50, -inf  ;;  %v2203_v43 = vld [vmem:[%s3573_s7] ss:$0 sm:$0xff] }
 0x7fe   : > { %1779 = vmax.xlane.f32.xlu0 %v1778_v55 }
 0x7ff   : > { %v1781_v56 = vsel %vm857_vm3, %v1769_v51, -inf }
 0x802   : > { %1782 = vmax.xlane.f32.xlu0 %v1781_v56 }
 0x818   : > { %1810 = vrot.lane.b32.xlu0 %v3276_v53, %s2875_s28  ;;  %s2781_s28 = sshll.u32 %s2876_s25, 4  ;;  %s2782_s28 = int_to_ptr.vmem [resolvable:$false] %s2781_s28 }
 0x819   : > { %s2783_s12 = scalar_lea.vmem %s2782_s28, 1024  ;;  %p2784_p6 = scmp.lt.s32.totalorder %s3469_s11, %s2782_s28 }
 0x81a   : > { %p2785_p11 = scmp.lt.s32.totalorder %s2783_s12, %s2777_s14 }
 0x81c   : > { %p2786_p0 = por %p2785_p11, %p2784_p6 }
 0x81e   : > { %p2787_p2 = pnand %p2786_p0, %p2780_p4 }
 0x863   : > { %v1774_v57 = vpop.xlane.xlu0 %1773 }
 0x864   : > { %v1784_v58 = vsub.f32 %v1715_v45, %v1774_v57 }
 0x865   : > { %v1777_v59 = vpop.xlane.xlu1 %1776 }
 0x866   : > { %v1788_v60 = vmul.f32 1.442695, %v1784_v58  ;;  %v1785_v52 = vsub.f32 %v1718_v48, %v1777_v59 }
 0x868   : > { %2589 = vpow2.f32 %v1788_v60  ;;  %v1790_v61 = vmul.f32 1.442695, %v1785_v52 }
 0x869   : > { %v1858_v62 = vpop.permute.xlu1 %1857 }
 0x86a   : > { %2591 = vpow2.f32 %v1790_v61  ;;  %2405 = vmatpush3.bf16.msra.mxu1 %v1858_v62 }
 0x86b   : > { %2431 = vmatprep.subr.msk.bf16.mxu1 %vm1252_vm4, %v1914_v11 }
 0x872   : > { %v2590_v63 = vpop.eup %2589 }
 0x873   : > { %v1796_v0 = vsel %vm857_vm3, %v2590_v63, 0.0 }
 0x874   : > { %v2592_v1 = vpop.eup %2591  ;;  %1797 = vadd.xlane.f32.xlu1 %v1796_v0 }
 0x875   : > { %v1799_v2 = vsel %vm857_vm3, %v2592_v1, 0.0  ;;  %v1808_v37 = vpack.c.bf16 %v2592_v1, %v2590_v63 }
 0x876   : > { %1800 = vadd.xlane.f32.xlu0 %v1799_v2 }
 0x88b   : > { %v1780_v3 = vpop.xlane.xlu0 %1779 }
 0x88c   : > { %v1786_v53 = vsub.f32 %v1766_v50, %v1780_v3 }
 0x88e   : > { %v1792_v4 = vmul.f32 1.442695, %v1786_v53 }
 0x88f   : > { %v1783_v5 = vpop.xlane.xlu0 %1782 }
 0x890   : > { %2593 = vpow2.f32 %v1792_v4  ;;  %v1787_v6 = vsub.f32 %v1769_v51, %v1783_v5 }
 0x892   : > { %v1794_v7 = vmul.f32 1.442695, %v1787_v6 }
 0x893   : > { %v1811_v34 = vpop.permute.xlu0 %1810 }
 0x894   : > { %2595 = vpow2.f32 %v1794_v7  ;;  %2399 = vmatpush3.bf16.msra.mxu0 %v1811_v34 }
 0x897   : > { %2401 = vmatmul.mubr.msk.bf16.vlgmr.msra.gmra.mrb[40].mxu0 %vm857_vm3, %v1808_v37 }
 0x89a   : > { %v2594_v8 = vpop.eup %2593 }
 0x89b   : > { %v1802_v9 = vsel %vm857_vm3, %v2594_v8, 0.0 }
 0x89c   : > { %1803 = vadd.xlane.f32.xlu0 %v1802_v9 }
 0x89e   : > { %v2596_v10 = vpop.eup %2595 }
 0x89f   : > { %v1805_v39 = vsel %vm857_vm3, %v2596_v10, 0.0  ;;  %v1809_v41 = vpack.c.bf16 %v2596_v10, %v2594_v8 }
 0x8a0   : > { %1806 = vadd.xlane.f32.xlu1 %v1805_v39 }
 0x8a1   : > { %2407 = vmatmul.mubr.msk.bf16.vlgmr.msra.gmra.mrb[32].mxu1 %vm857_vm3, %v1809_v41 }
 0x8a2   : > { %2411 = vmatpush3.bf16.msra.mxu1 %v1922_v12 }
 0x901   : > { %v1798_v13 = vpop.xlane.xlu1 %1797 }
 0x902   : > { %2597 = vrcp.f32 %v1798_v13 }
 0x903   : > { %v1801_v14 = vpop.xlane.xlu0 %1800 }
 0x904   : > { %2599 = vrcp.f32 %v1801_v14 }
 0x90c   : > { %v2598_v19 = vpop.eup %2597 }
 0x90e   : > { %v2600_v21 = vpop.eup %2599 }
 0x929   : > { %v1804_v15 = vpop.xlane.xlu0 %1803 }
 0x92a   : > { %2601 = vrcp.f32 %v1804_v15 }
 0x92d   : > { %v1807_v16 = vpop.xlane.xlu1 %1806 }
 0x92e   : > { %2603 = vrcp.f32 %v1807_v16 }
 0x934   : > { %v2602_v30 = vpop.eup %2601 }
 0x938   : > { %v2604_v32 = vpop.eup %2603 }
 0x96a   : > { %v1850_v17 = vpop.f32.mrb[40].mxu0 }
 0x96b   : > { %v2402_v20 = vpop.f32.mrb[41].mxu0  ;;  %v1908_v25 = vmul.f32 %v2598_v19, %v1850_v17 }
 0x96c   : > { %v1853_v22 = vpop.f32.mrb[42].mxu0 }
 0x96d   : > { %v1909_v42 = vmul.f32 %v2600_v21, %v1853_v22  ;;  %v2403_v27 = vpop.f32.mrb[43].mxu0 }
 0x96f   : > { %v1912_v44 = vpack.c.bf16 %v1909_v42, %v1908_v25 }
 0x971   : > { %2412 = vmatprep.mubr.msk.bf16.mxu1 %vm762_vm2, %v1912_v44 }
 0x974   : > { %v1897_v29 = vpop.f32.mrb[32].mxu1 }
 0x975   : > { %v2408_v31 = vpop.f32.mrb[33].mxu1  ;;  %v1910_v36 = vmul.f32 %v2602_v30, %v1897_v29 }
 0x976   : > { %v1900_v33 = vpop.f32.mrb[34].mxu1 }
 0x977   : > { %v1911_v35 = vmul.f32 %v2604_v32, %v1900_v33  ;;  %v2409_v40 = vpop.f32.mrb[35].mxu1 }
 0x979   : > { %v1913_v38 = vpack.c.bf16 %v1911_v35, %v1910_v36 }
 0x97b   : > { %2413 = vmatmul.mubr.msk.bf16.vlgmr.msra.gmra.mrb[20].mxu1 %vm762_vm2, %v1913_v38 }
 0xa4e   : > { %v2414_v45 = vpop.f32.mrb[20].mxu1 }
 0xa4f   : > { %v1986_v46 = vadd.f32 %v2414_v45, %v2203_v43  ;;  %v1958_v47 = vpop.f32.mrb[21].mxu1 }
 0xa50   : > { %v1984_v48 = vadd.f32 %v2203_v43, %v1958_v47  ;;  %v2415_v49 = vpop.f32.mrb[22].mxu1 }
 0xa51   : > { %1990 = vst.msk [vmem:[%s502_s26 + $0x10] sm:$0xff] %vm542_vm0, %v1986_v46  ;;  %v1987_v26 = vadd.f32 %v2415_v49, %v2203_v43  ;;  %v1961_v23 = vpop.f32.mrb[23].mxu1 }
 0xa52   : > { %1988 = vst.msk [vmem:[%s502_s26] sm:$0xff] %vm542_vm0, %v1984_v48  ;;  %v1985_v28 = vadd.f32 %v2203_v43, %v1961_v23 }
 0xa53   : > { %1991 = vst.msk [vmem:[%s502_s26 + $0x18] sm:$0xff] %vm542_vm0, %v1987_v26 }
 0xa54   : > { %1989 = vst.msk [vmem:[%s502_s26 + $0x8] sm:$0xff] %vm542_vm0, %v1985_v28 }
 0xa55   : > { %2790 = shalt.err (!%p2787_p2)
}
 0xa56   : > { %s2791_s23 = scalar_lea.hbm %s3475_s10, 512  ;;  %s2795_s24 = scalar_lea.hbm %s3574_s0, 2048 }
 0xa57   : > { %p2792_p10 = scmp.ne.s32.totalorder %s3475_s10, %s2791_s23  ;;  %p2796_p7 = scmp.lt.u32.totalorder %s3475_s10, %s3574_s0 }
 0xa58   : > { %p2797_p9 = scmp.lt.u32.totalorder %s2795_s24, %s2791_s23  ;;  %p2799_p5 = scmp.lt.u32.totalorder %s2791_s23, %s3475_s10 }
 0xa59   : > { %p2793_p13 = pnand %p2792_p10, %p3101_p8 }
 0xa5a   : > { %p2798_p12 = por %p2797_p9, %p2796_p7 }
 0xa5b   : > { %p2794_p3 = pneg %p2793_p13 }
 0xa5c   : > { %p2800_p1 = por %p2799_p5, %p2798_p12 }
 0xa5e   : > { %p2801_p4 = pnand %p2800_p1, %p2794_p3 }
 0xa60   : > { %2804 = shalt.err (!%p2801_p4)
}
 0xa61   : > { %s2877_s26 = smov 128   ;;  %s2878_s17 = smov 8  }
 0xa62   : > { %2452 = dma.vmem_to_hbm [thread:$0]  (%p3101_p8), %s3469_s11, 512, %s3475_s10, %s1993_s21, %s2877_s26, %s2877_s26, %s2878_s17  }
 0xa63 PF: > { %s3575_s27 = sld [smem:[#allocation20_spill]]  ;;  %s3576_s29 = sld [smem:[#allocation21_spill]] }
 0xa64   : > { %p2487_p6 = scmp.ge.s32.totalorder %s2859_s20, 2 }
 0xa69   : > { %s2022_s14 = sand.u32 1, %s3575_s27   ;;  %p3577_p11 = scmp.ne.s32.totalorder %s3576_s29, 0 }
 0xa6a   : > { %s2023_s25 = scalar_lea.sflag [#allocation4], %s2022_s14 }
 0xa6b   : > { %p2475_p0 = pnand %p2487_p6, %p3577_p11 }
 0xa6d   : > { %2842 = dma.done.wait (!%p2475_p0), %s2023_s25, 512  }
 0xa6e   : > { %2844 = vsyncadd (!%p2475_p0), %s2023_s25, 4294966784  ;;  %p29_p2 = scmp.ge.s32.totalorder %s3088_s22, 6   ;;  %s3578_s17 = smov %s2851_s18 }
 0xa6f   : > { %s3579_s18 = smov %s2855_s19  ;;  %s3580_s19 = smov %s3097_s15 }
 0xa70   : > { %s3581_s20 = smov %s3088_s22  ;;  %31 = sbr.rel (!%p29_p2) target bundleno = 16 (0x10), region = 138 }
 0xa77   :  { %2028 = vsyncpa [#allocation3], 1 }
 0xa78   :  { %2030 = vsyncpa [#allocation3 + $0x1], 1 }
 0xa79   :  { %2031 = vsyncpa [#allocation6], 1 }
 0xa7a   :  { %2033 = vsyncpa [#allocation6 + $0x1], 1 }
 0xa7b   :  { %2034 = vsyncpa [#allocation9], 1 }
 0xa7c   :  { %2035 = vsyncpa [#allocation12], 1 }
 0xa7d   :  { %2036 = vsyncpa [#allocation4], 1 }
 0xa7e   :  { %2038 = vsyncpa [#allocation4 + $0x1], 1 }

</bundles_post_ra>
